<compile_context>
chip_gen: v7x
topology: tpu7x:2x2x1
jax: 0.10.0
libtpu: 0.0.40
codegen_flags: <defaults>
</compile_context>

<pallas_src>
import functools

import jax
import jax.numpy as jnp
from jax import lax
from jax.experimental import pallas as pl
from jax.experimental.pallas import tpu as pltpu


# ---------------------------------------------------------------------------
# Fused kernel
# ---------------------------------------------------------------------------
def _fused_inverted_residual_kernel(*refs, H, W, Cin, Chid, Cout,
                                    stride, TH, slab_rows, expand, shortcut):
    # scratch layout: [..., hid_ref, pj_ref]
    hid_ref, pj_ref = refs[-2], refs[-1]
    io_refs = refs[:-2]
    if expand:
        (x_ref, w1_ref, s1_ref, b1_ref, wdw_ref, b2_ref,
         w3_ref, s3_ref, b3_ref, o_ref) = io_refs
    else:
        (x_ref, wdw_ref, b2_ref, w3_ref, s3_ref, b3_ref, o_ref) = io_refs

    r = pl.program_id(1)
    oh0 = pl.multiple_of(r * TH, TH)          # first output row of this tile
    rows_in = stride * (TH - 1) + 3           # input rows needed (incl. 3x3 halo)
    W_out = W if stride == 1 else W // 2
    Wp = W + 2 if stride == 1 else W + 1

    # Hoist the small resident operands once per grid step.
    wdw = wdw_ref[...]                                  # (9, Chid) f32, s2 folded
    wk = [wdw[k].reshape(1, Chid) for k in range(9)]    # hoisted tap rows
    b2 = b2_ref[...]                                    # (1, Chid)   f32
    w3 = w3_ref[...]                                    # (Chid, Cout) bf16
    s3, b3 = s3_ref[...], b3_ref[...]                   # (1, Cout)   f32
    if expand:
        w1 = w1_ref[...]                                # (Cin, Chid) bf16
        s1, b1 = s1_ref[...], b1_ref[...]               # (1, Chid)   f32

    # ---- zero the halo rows / width-padding column(s) of the hidden scratch.
    # hid row m holds input row (oh0*stride - 1) + (m - 1); rows 1 and rows_in
    # are the only ones that can correspond to out-of-image rows, so pre-zero
    # them (interior tiles simply overwrite them below).
    zrow = jnp.zeros((1, Wp, Chid), jnp.float32)
    hid_ref[1:2] = zrow
    hid_ref[rows_in:rows_in + 1] = zrow
    zcol = jnp.zeros((rows_in + 2, 1, Chid), jnp.float32)
    if stride == 1:
        hid_ref[:, 0:1, :] = zcol
        hid_ref[:, W + 1:W + 2, :] = zcol
    else:
        hid_ref[:, W_out:W_out + 1, :] = zcol           # pad between even/odd banks

    # ---- stage 1: ONE slab matmul for the 1x1 expand conv + BN + ReLU6 ------
    ih0 = oh0 * stride - 1                              # first (virtual) halo row
    start = jnp.clip(ih0, 0, H - slab_rows)             # clamped slab start in x
    dst0 = start - ih0 + 1                              # destination row in hid
    x_slab = x_ref[pl.ds(start, slab_rows)]             # (slab_rows, W, Cin) f32
    if expand:
        h = jnp.dot(x_slab.reshape(slab_rows * W, Cin).astype(jnp.bfloat16),
                    w1, preferred_element_type=jnp.float32)
        h = jnp.clip(h * s1 + b1, 0.0, 6.0)
        h3 = h.reshape(slab_rows, W, Chid)
    else:
        h3 = x_slab                                     # identity expand (t == 1)
    if stride == 1:
        hid_ref[pl.ds(dst0, slab_rows), 1:W + 1, :] = h3
    else:   # even / odd column banks (wrapper already permuted columns)
        hid_ref[pl.ds(dst0, slab_rows), 0:W_out, :] = h3[:, 0:W_out, :]
        hid_ref[pl.ds(dst0, slab_rows), W_out + 1:W + 1, :] = h3[:, W_out:W, :]

    # ---- stage 2: 3x3 depthwise conv (stride + BN scale folded) + bias + ReLU6
    # per-output-row loop bounds vreg pressure; result goes straight to a bf16
    # scratch that feeds the projection matmul (no f32 round-trip).
    def dw_row(t, carry):
        acc = jnp.zeros((W_out, Chid), jnp.float32)
        for kh in range(3):
            row = hid_ref[stride * t + kh + 1]          # (Wp, Chid)
            if stride == 1:
                for kw in range(3):
                    acc = acc + row[kw:kw + W, :] * wk[3 * kh + kw]
            else:
                acc = acc + row[W_out:2 * W_out, :] * wk[3 * kh + 0]          # iw-1
                acc = acc + row[0:W_out, :] * wk[3 * kh + 1]                  # iw
                acc = acc + row[W_out + 1:2 * W_out + 1, :] * wk[3 * kh + 2]  # iw+1
        val = jnp.clip(acc + b2, 0.0, 6.0).astype(jnp.bfloat16)
        pj_ref[pl.ds(pl.multiple_of(t * W_out, W_out), W_out), :] = val
        return carry

    lax.fori_loop(0, TH, dw_row, 0)

    # ---- stage 3: 1x1 project conv + BN (+ fused residual) ------------------
    y = jnp.dot(pj_ref[...], w3, preferred_element_type=jnp.float32)
    y = y * s3 + b3
    if shortcut:                                        # stride == 1 and Cin == Cout
        res = x_ref[pl.ds(oh0, TH)]                     # (TH, W, Cin) f32
        y = y + res.reshape(TH * W, Cin)
    o_ref[...] = y.reshape(TH, W_out, Cout).astype(o_ref.dtype)


# ---------------------------------------------------------------------------
# VMEM budget / tiling helpers
# ---------------------------------------------------------------------------
def _round_up(v, m):
    return (v + m - 1) // m * m


def _padded_bytes(shape, itemsize):
    s = list(shape)
    s[-1] = _round_up(s[-1], 128)
    if len(s) >= 2:
        s[-2] = _round_up(s[-2], 8)
    n = 1
    for d in s:
        n *= d
    return n * itemsize


def _vmem_estimate_bytes(H, W, Cin, Chid, Cout, TH, W_out, rows_in, Wp, expand):
    est = 2 * _padded_bytes((H, W, Cin), 4)              # x block (double-buffered)
    est += 2 * _padded_bytes((TH, W_out, Cout), 4)       # output block
    est += 2 * (_padded_bytes((9, Chid), 4)              # weights / BN affines
                + _padded_bytes((1, Chid), 4)
                + _padded_bytes((Chid, Cout), 2)
                + 2 * _padded_bytes((1, Cout), 4))
    if expand:
        est += 2 * (_padded_bytes((Cin, Chid), 2) + 2 * _padded_bytes((1, Chid), 4))
    est += _padded_bytes((rows_in + 2, Wp, Chid), 4)     # hidden scratch (f32)
    est += _padded_bytes((TH * W_out, Chid), 2)          # projection-input scratch (bf16)
    est += 4 << 20                                       # slack
    return est


def _vmem_limit_bytes(est_bytes):
    # Use the real per-chip VMEM capacity (128 MiB v5e/v6e, 64 MiB v7x) minus
    # headroom rather than a hard 64 MiB cap.
    try:
        cap = int(pltpu.get_tpu_info().vmem_capacity_bytes)
    except Exception:
        cap = 128 << 20
    limit = min(max(int(est_bytes), 32 << 20), cap - (8 << 20))
    return int(max(limit, 16 << 20))


def _pick_row_tile(h_out, target):
    # Pick the divisor of h_out closest to the target tile (prefer larger on tie).
    # TODO(synk): pad H_out and mask tail rows instead of snapping to a divisor
    #             for awkward (prime) H_out values.
    target = max(1, min(target, h_out))
    divs = [d for d in range(1, h_out + 1) if h_out % d == 0]
    return min(divs, key=lambda d: (abs(d - target), -d))


# ---------------------------------------------------------------------------
# Public wrapper (NCHW in / NCHW out, like the PyTorch module)
# ---------------------------------------------------------------------------
def inverted_residual_forward(x_nchw, params, *, stride, expand_ratio,
                              in_channel, out_channel, row_tile=16):
    assert stride in (1, 2)
    B, C, H, W = x_nchw.shape
    assert C == in_channel
    if stride == 2:
        assert W % 2 == 0, "stride-2 path assumes even width"

    expand = expand_ratio != 1
    hidden = in_channel * expand_ratio
    use_shortcut = (stride == 1) and (in_channel == out_channel)

    H_out = (H - 1) // stride + 1
    W_out = (W - 1) // stride + 1
    TH = _pick_row_tile(H_out, row_tile)
    R = H_out // TH
    rows_in = stride * (TH - 1) + 3
    slab_rows = min(rows_in, H)
    Wp = W + 2 if stride == 1 else W + 1

    # NCHW -> NHWC (channels on the lane axis).
    # TODO(synk): a full model should stay NHWC (and bf16) end-to-end to drop
    #             these extra HBM passes.
    x = jnp.transpose(x_nchw, (0, 2, 3, 1))
    if stride == 2:
        # Column-parity permutation: cols [0, W/2) = even input columns,
        # [W/2, W) = odd ones, so the kernel only needs contiguous slices.
        # TODO(synk): fold this permute into the kernel via strided pl.ds loads
        #             to save one full HBM read+write of the input.
        x = jnp.concatenate([x[:, :, 0::2, :], x[:, :, 1::2, :]], axis=2)

    # Fold the depthwise BN scale into the 3x3 taps (exact, f32 x f32).
    w_dw_scaled = (params["w_dw"] *
                   params["s2"].reshape(1, 1, hidden)).reshape(9, hidden)

    args = [x]
    if expand:
        args += [params["w1"].astype(jnp.bfloat16),
                 params["s1"].reshape(1, hidden).astype(jnp.float32),
                 params["b1"].reshape(1, hidden).astype(jnp.float32)]
    args += [w_dw_scaled.astype(jnp.float32),
             params["b2"].reshape(1, hidden).astype(jnp.float32),
             params["w3"].astype(jnp.bfloat16),
             params["s3"].reshape(1, out_channel).astype(jnp.float32),
             params["b3"].reshape(1, out_channel).astype(jnp.float32)]

    # TODO(synk): for very large H*W on v7x (64 MiB VMEM), switch in_specs[0]
    #             to a halo-row window (manual DMA / pl.Element rows) instead
    #             of a full-image resident block.
    in_specs = [pl.BlockSpec((None, H, W, in_channel),
                             lambda b, r: (b, 0, 0, 0))]
    for a in args[1:]:   # weights / affines: resident across the whole grid
        in_specs.append(pl.BlockSpec(a.shape, lambda b, r, _n=a.ndim: (0,) * _n))
    out_specs = pl.BlockSpec((None, TH, W_out, out_channel),
                             lambda b, r: (b, r, 0, 0))

    scratch_shapes = [pltpu.VMEM((rows_in + 2, Wp, hidden), jnp.float32),
                      pltpu.VMEM((TH * W_out, hidden), jnp.bfloat16)]

    kernel = functools.partial(
        _fused_inverted_residual_kernel,
        H=H, W=W, Cin=in_channel, Chid=hidden, Cout=out_channel,
        stride=stride, TH=TH, slab_rows=slab_rows, expand=expand,
        shortcut=use_shortcut)

    est = _vmem_estimate_bytes(H, W, in_channel, hidden, out_channel,
                               TH, W_out, rows_in, Wp, expand)

    out_nhwc = pl.pallas_call(
        kernel,
        grid=(B, R),
        in_specs=in_specs,
        out_specs=out_specs,
        out_shape=jax.ShapeDtypeStruct((B, H_out, W_out, out_channel),
                                       x_nchw.dtype),
        scratch_shapes=scratch_shapes,
        compiler_params=pltpu.CompilerParams(
            # Batch axis is the megacore-parallel axis; the row axis is
            # sequential per core (input block stays resident, no duplication).
            dimension_semantics=("parallel", "arbitrary"),
            vmem_limit_bytes=_vmem_limit_bytes(est)),
    )(*args)

    return jnp.transpose(out_nhwc, (0, 3, 1, 2))    # NHWC -> NCHW


# ---------------------------------------------------------------------------
# Parameter construction (BN folded to per-channel scale/bias, inference mode)
# ---------------------------------------------------------------------------
def _fold_bn(gamma, beta, mean, var, eps=1e-5):
    scale = gamma / jnp.sqrt(var + eps)
    bias = beta - mean * scale
    return scale, bias


def init_inverted_residual_params(key, in_channel, out_channel, expand_ratio):
    hidden = in_channel * expand_ratio
    ks = jax.random.split(key, 12)
    p = {}
    if expand_ratio != 1:
        # PyTorch conv1 weight: (hidden, in, 1, 1) -> stored as (in, hidden)
        p["w1"] = 0.1 * jax.random.normal(ks[0], (in_channel, hidden), jnp.float32)
        g = 1.0 + 0.1 * jax.random.normal(ks[1], (hidden,), jnp.float32)
        b = 0.1 * jax.random.normal(ks[2], (hidden,), jnp.float32)
        m = 0.1 * jax.random.normal(ks[3], (hidden,), jnp.float32)
        v = jnp.abs(jax.random.normal(ks[4], (hidden,), jnp.float32)) + 0.5
        p["s1"], p["b1"] = _fold_bn(g, b, m, v)
    # depthwise weight: PyTorch (hidden, 1, 3, 3) -> stored as (3, 3, hidden)
    p["w_dw"] = 0.1 * jax.random.normal(ks[5], (3, 3, hidden), jnp.float32)
    g = 1.0 + 0.1 * jax.random.normal(ks[6], (hidden,), jnp.float32)
    b = 0.1 * jax.random.normal(ks[7], (hidden,), jnp.float32)
    m = 0.1 * jax.random.normal(ks[8], (hidden,), jnp.float32)
    v = jnp.abs(jax.random.normal(ks[9], (hidden,), jnp.float32)) + 0.5
    p["s2"], p["b2"] = _fold_bn(g, b, m, v)
    # projection conv: PyTorch (out, hidden, 1, 1) -> stored as (hidden, out)
    p["w3"] = 0.1 * jax.random.normal(ks[10], (hidden, out_channel), jnp.float32)
    g = 1.0 + 0.1 * jax.random.normal(ks[11], (out_channel,), jnp.float32)
    b = 0.1 * jax.random.normal(jax.random.fold_in(key, 99), (out_channel,), jnp.float32)
    m = 0.1 * jax.random.normal(jax.random.fold_in(key, 100), (out_channel,), jnp.float32)
    v = jnp.abs(jax.random.normal(jax.random.fold_in(key, 101), (out_channel,), jnp.float32)) + 0.5
    p["s3"], p["b3"] = _fold_bn(g, b, m, v)
    return p


# ---------------------------------------------------------------------------
# Pure-JAX reference (mirrors the kernel's bf16 matmul inputs / f32 accumulate)
# ---------------------------------------------------------------------------
def _ref_forward(x_nchw, p, *, stride, expand_ratio, in_channel, out_channel):
    use_shortcut = (stride == 1) and (in_channel == out_channel)
    x = jnp.transpose(x_nchw, (0, 2, 3, 1))
    h = x
    if expand_ratio != 1:
        xb = x.astype(jnp.bfloat16).astype(jnp.float32)
        w1b = p["w1"].astype(jnp.bfloat16).astype(jnp.float32)
        h = jnp.einsum("bhwc,cd->bhwd", xb, w1b)
        h = jnp.clip(h * p["s1"] + p["b1"], 0.0, 6.0)
    C = h.shape[-1]
    rhs = p["w_dw"].reshape(3, 3, 1, C)  # HWIO, feature_group_count=C
    d = lax.conv_general_dilated(
        h, rhs, window_strides=(stride, stride), padding=((1, 1), (1, 1)),
        dimension_numbers=("NHWC", "HWIO", "NHWC"), feature_group_count=C)
    d = jnp.clip(d * p["s2"] + p["b2"], 0.0, 6.0)
    db = d.astype(jnp.bfloat16).astype(jnp.float32)
    w3b = p["w3"].astype(jnp.bfloat16).astype(jnp.float32)
    o = jnp.einsum("bhwc,cd->bhwd", db, w3b)
    o = o * p["s3"] + p["b3"]
    if use_shortcut:
        o = o + x
    return jnp.transpose(o, (0, 3, 1, 2))


# ---------------------------------------------------------------------------
if __name__ == "__main__":
    key = jax.random.PRNGKey(0)
    configs = [
        # (B, Cin, Cout, H, W, stride, expand_ratio)
        dict(B=2, Cin=8, Cout=8, H=16, W=16, stride=1, expand_ratio=2),
        dict(B=2, Cin=8, Cout=16, H=16, W=16, stride=2, expand_ratio=2),
        dict(B=2, Cin=8, Cout=8, H=16, W=16, stride=1, expand_ratio=1),
    ]
    for i, cfg in enumerate(configs):
        kx, kp = jax.random.split(jax.random.fold_in(key, i))
        x = jax.random.normal(kx, (cfg["B"], cfg["Cin"], cfg["H"], cfg["W"]),
                              jnp.float32)
        params = init_inverted_residual_params(
            kp, cfg["Cin"], cfg["Cout"], cfg["expand_ratio"])

        out = inverted_residual_forward(
            x, params, stride=cfg["stride"], expand_ratio=cfg["expand_ratio"],
            in_channel=cfg["Cin"], out_channel=cfg["Cout"])
        out = jax.block_until_ready(out)

        ref = _ref_forward(x, params, stride=cfg["stride"],
                           expand_ratio=cfg["expand_ratio"],
                           in_channel=cfg["Cin"], out_channel=cfg["Cout"])
        h_out = (cfg["H"] - 1) // cfg["stride"] + 1
        w_out = (cfg["W"] - 1) // cfg["stride"] + 1
        assert out.shape == (cfg["B"], cfg["Cout"], h_out, w_out)
        assert jnp.allclose(out, ref, rtol=2e-3, atol=2e-3), float(
            jnp.max(jnp.abs(out - ref)))

    print("KERNEL_OK")
</pallas_src>

<mosaic_0001>
module attributes {stable_mosaic.version = 11 : i64} {
  func.func @_fused_inverted_residual_kernel(%arg0: i32, %arg1: i32, %arg2: memref<1x16x16x8xf32, #tpu.memory_space<vmem>>, %arg3: memref<8x16xbf16, #tpu.memory_space<vmem>>, %arg4: memref<1x16xf32, #tpu.memory_space<vmem>>, %arg5: memref<1x16xf32, #tpu.memory_space<vmem>>, %arg6: memref<9x16xf32, #tpu.memory_space<vmem>>, %arg7: memref<1x16xf32, #tpu.memory_space<vmem>>, %arg8: memref<16x8xbf16, #tpu.memory_space<vmem>>, %arg9: memref<1x8xf32, #tpu.memory_space<vmem>>, %arg10: memref<1x8xf32, #tpu.memory_space<vmem>>, %arg11: memref<1x16x16x8xf32, #tpu.memory_space<vmem>>, %arg12: memref<20x18x16xf32, #tpu.memory_space<vmem>>, %arg13: memref<256x16xbf16, #tpu.memory_space<vmem>>) attributes {dimension_semantics = [#tpu.dimension_semantics<parallel>, #tpu.dimension_semantics<arbitrary>], iteration_bounds = array<i64: 2, 1>, scalar_prefetch = 0 : i64, scratch_operands = 2 : i64, tpu.core_type = #tpu.core_type<tc>, window_params = [{transform_indices = @transform_0, window_bounds = array<i64: 1, 16, 16, 8>}, {pipeline_mode = #tpu.pipeline_mode<synchronous>, transform_indices = @transform_1, window_bounds = array<i64: 8, 16>}, {pipeline_mode = #tpu.pipeline_mode<synchronous>, transform_indices = @transform_2, window_bounds = array<i64: 1, 16>}, {pipeline_mode = #tpu.pipeline_mode<synchronous>, transform_indices = @transform_3, window_bounds = array<i64: 1, 16>}, {pipeline_mode = #tpu.pipeline_mode<synchronous>, transform_indices = @transform_4, window_bounds = array<i64: 9, 16>}, {pipeline_mode = #tpu.pipeline_mode<synchronous>, transform_indices = @transform_5, window_bounds = array<i64: 1, 16>}, {pipeline_mode = #tpu.pipeline_mode<synchronous>, transform_indices = @transform_6, window_bounds = array<i64: 16, 8>}, {pipeline_mode = #tpu.pipeline_mode<synchronous>, transform_indices = @transform_7, window_bounds = array<i64: 1, 8>}, {pipeline_mode = #tpu.pipeline_mode<synchronous>, transform_indices = @transform_8, window_bounds = array<i64: 1, 8>}, {transform_indices = @transform_9, window_bounds = array<i64: 1, 16, 16, 8>}]} {
    %c16_i32 = arith.constant 16 : i32
    %0 = arith.muli %arg1, %c16_i32 : i32
    %1 = tpu.assume_multiple %0, 16 : i32
    %c0 = arith.constant 0 : index
    %c0_0 = arith.constant 0 : index
    %2 = vector.load %arg6[%c0, %c0_0] : memref<9x16xf32, #tpu.memory_space<vmem>>, vector<9x16xf32>
    %3 = vector.extract_strided_slice %2 {offsets = [0, 0], sizes = [1, 16], strides = [1, 1]} : vector<9x16xf32> to vector<1x16xf32>
    %4 = vector.shape_cast %3 : vector<1x16xf32> to vector<16xf32>
    %5 = vector.shape_cast %4 : vector<16xf32> to vector<1x16xf32>
    %6 = vector.extract_strided_slice %2 {offsets = [1, 0], sizes = [1, 16], strides = [1, 1]} : vector<9x16xf32> to vector<1x16xf32>
    %7 = vector.shape_cast %6 : vector<1x16xf32> to vector<16xf32>
    %8 = vector.shape_cast %7 : vector<16xf32> to vector<1x16xf32>
    %9 = vector.extract_strided_slice %2 {offsets = [2, 0], sizes = [1, 16], strides = [1, 1]} : vector<9x16xf32> to vector<1x16xf32>
    %10 = vector.shape_cast %9 : vector<1x16xf32> to vector<16xf32>
    %11 = vector.shape_cast %10 : vector<16xf32> to vector<1x16xf32>
    %12 = vector.extract_strided_slice %2 {offsets = [3, 0], sizes = [1, 16], strides = [1, 1]} : vector<9x16xf32> to vector<1x16xf32>
    %13 = vector.shape_cast %12 : vector<1x16xf32> to vector<16xf32>
    %14 = vector.shape_cast %13 : vector<16xf32> to vector<1x16xf32>
    %15 = vector.extract_strided_slice %2 {offsets = [4, 0], sizes = [1, 16], strides = [1, 1]} : vector<9x16xf32> to vector<1x16xf32>
    %16 = vector.shape_cast %15 : vector<1x16xf32> to vector<16xf32>
    %17 = vector.shape_cast %16 : vector<16xf32> to vector<1x16xf32>
    %18 = vector.extract_strided_slice %2 {offsets = [5, 0], sizes = [1, 16], strides = [1, 1]} : vector<9x16xf32> to vector<1x16xf32>
    %19 = vector.shape_cast %18 : vector<1x16xf32> to vector<16xf32>
    %20 = vector.shape_cast %19 : vector<16xf32> to vector<1x16xf32>
    %21 = vector.extract_strided_slice %2 {offsets = [6, 0], sizes = [1, 16], strides = [1, 1]} : vector<9x16xf32> to vector<1x16xf32>
    %22 = vector.shape_cast %21 : vector<1x16xf32> to vector<16xf32>
    %23 = vector.shape_cast %22 : vector<16xf32> to vector<1x16xf32>
    %24 = vector.extract_strided_slice %2 {offsets = [7, 0], sizes = [1, 16], strides = [1, 1]} : vector<9x16xf32> to vector<1x16xf32>
    %25 = vector.shape_cast %24 : vector<1x16xf32> to vector<16xf32>
    %26 = vector.shape_cast %25 : vector<16xf32> to vector<1x16xf32>
    %27 = vector.extract_strided_slice %2 {offsets = [8, 0], sizes = [1, 16], strides = [1, 1]} : vector<9x16xf32> to vector<1x16xf32>
    %28 = vector.shape_cast %27 : vector<1x16xf32> to vector<16xf32>
    %29 = vector.shape_cast %28 : vector<16xf32> to vector<1x16xf32>
    %c0_1 = arith.constant 0 : index
    %c0_2 = arith.constant 0 : index
    %30 = vector.load %arg7[%c0_1, %c0_2] : memref<1x16xf32, #tpu.memory_space<vmem>>, vector<1x16xf32>
    %c0_3 = arith.constant 0 : index
    %c0_4 = arith.constant 0 : index
    %31 = vector.load %arg8[%c0_3, %c0_4] : memref<16x8xbf16, #tpu.memory_space<vmem>>, vector<16x8xbf16>
    %c0_5 = arith.constant 0 : index
    %c0_6 = arith.constant 0 : index
    %32 = vector.load %arg9[%c0_5, %c0_6] : memref<1x8xf32, #tpu.memory_space<vmem>>, vector<1x8xf32>
    %c0_7 = arith.constant 0 : index
    %c0_8 = arith.constant 0 : index
    %33 = vector.load %arg10[%c0_7, %c0_8] : memref<1x8xf32, #tpu.memory_space<vmem>>, vector<1x8xf32>
    %c0_9 = arith.constant 0 : index
    %c0_10 = arith.constant 0 : index
    %34 = vector.load %arg3[%c0_9, %c0_10] : memref<8x16xbf16, #tpu.memory_space<vmem>>, vector<8x16xbf16>
    %c0_11 = arith.constant 0 : index
    %c0_12 = arith.constant 0 : index
    %35 = vector.load %arg4[%c0_11, %c0_12] : memref<1x16xf32, #tpu.memory_space<vmem>>, vector<1x16xf32>
    %c0_13 = arith.constant 0 : index
    %c0_14 = arith.constant 0 : index
    %36 = vector.load %arg5[%c0_13, %c0_14] : memref<1x16xf32, #tpu.memory_space<vmem>>, vector<1x16xf32>
    %cst = arith.constant 0.000000e+00 : f32
    %37 = vector.broadcast %cst : f32 to vector<1x18x16xf32>
    %c1 = arith.constant 1 : index
    %c0_15 = arith.constant 0 : index
    %c0_16 = arith.constant 0 : index
    %38 = vector.load %arg12[%c1, %c0_15, %c0_16] : memref<20x18x16xf32, #tpu.memory_space<vmem>>, vector<1x18x16xf32>
    tpu.vector_store %arg12[%c1, %c0_15, %c0_16], %37 {strides = array<i32>} : memref<20x18x16xf32, #tpu.memory_space<vmem>>, vector<1x18x16xf32>,
    %c18 = arith.constant 18 : index
    %c0_17 = arith.constant 0 : index
    %c0_18 = arith.constant 0 : index
    %39 = vector.load %arg12[%c18, %c0_17, %c0_18] : memref<20x18x16xf32, #tpu.memory_space<vmem>>, vector<1x18x16xf32>
    tpu.vector_store %arg12[%c18, %c0_17, %c0_18], %37 {strides = array<i32>} : memref<20x18x16xf32, #tpu.memory_space<vmem>>, vector<1x18x16xf32>,
    %cst_19 = arith.constant 0.000000e+00 : f32
    %40 = vector.broadcast %cst_19 : f32 to vector<20x1x16xf32>
    %c0_20 = arith.constant 0 : index
    %c0_21 = arith.constant 0 : index
    %c0_22 = arith.constant 0 : index
    %41 = vector.load %arg12[%c0_20, %c0_21, %c0_22] : memref<20x18x16xf32, #tpu.memory_space<vmem>>, vector<20x1x16xf32>
    tpu.vector_store %arg12[%c0_20, %c0_21, %c0_22], %40 {strides = array<i32>} : memref<20x18x16xf32, #tpu.memory_space<vmem>>, vector<20x1x16xf32>,
    %c0_23 = arith.constant 0 : index
    %c17 = arith.constant 17 : index
    %c0_24 = arith.constant 0 : index
    %42 = vector.load %arg12[%c0_23, %c17, %c0_24] : memref<20x18x16xf32, #tpu.memory_space<vmem>>, vector<20x1x16xf32>
    tpu.vector_store %arg12[%c0_23, %c17, %c0_24], %40 {strides = array<i32>} : memref<20x18x16xf32, #tpu.memory_space<vmem>>, vector<20x1x16xf32>,
    %c1_i32 = arith.constant 1 : i32
    %43 = arith.muli %1, %c1_i32 : i32
    %c1_i32_25 = arith.constant 1 : i32
    %44 = arith.subi %43, %c1_i32_25 : i32
    %c0_i32 = arith.constant 0 : i32
    %c0_i32_26 = arith.constant 0 : i32
    %45 = arith.maxsi %c0_i32, %44 : i32
    %46 = arith.minsi %c0_i32_26, %45 : i32
    %47 = arith.subi %46, %44 : i32
    %c1_i32_27 = arith.constant 1 : i32
    %48 = arith.addi %47, %c1_i32_27 : i32
    %c0_28 = arith.constant 0 : index
    %49 = arith.index_cast %46 : i32 to index
    %c0_29 = arith.constant 0 : index
    %c0_30 = arith.constant 0 : index
    %50 = vector.load %arg2[%c0_28, %49, %c0_29, %c0_30] : memref<1x16x16x8xf32, #tpu.memory_space<vmem>>, vector<1x16x16x8xf32>
    %51 = vector.shape_cast %50 : vector<1x16x16x8xf32> to vector<16x16x8xf32>
    %52 = vector.shape_cast %51 : vector<16x16x8xf32> to vector<256x8xf32>
    %53 = arith.truncf %52 : vector<256x8xf32> to vector<256x8xbf16>
    %cst_31 = arith.constant dense<0.000000e+00> : vector<256x16xf32>
    %54 = tpu.matmul %53, %34, %cst_31 {dimension_numbers = #tpu.dot_dimension_numbers<[1], [0], [0], [1], [0, 0, 1, 1], [], []>} : vector<256x8xbf16>, vector<8x16xbf16>, vector<256x16xf32> -> vector<256x16xf32>
    %55 = vector.broadcast %35 : vector<1x16xf32> to vector<256x16xf32>
    %56 = arith.mulf %54, %55 : vector<256x16xf32>
    %57 = vector.broadcast %36 : vector<1x16xf32> to vector<256x16xf32>
    %58 = arith.addf %56, %57 : vector<256x16xf32>
    %cst_32 = arith.constant 0.000000e+00 : f32
    %cst_33 = arith.constant 6.000000e+00 : f32
    %59 = vector.broadcast %cst_32 : f32 to vector<256x16xf32>
    %60 = arith.maximumf %59, %58 : vector<256x16xf32>
    %61 = vector.broadcast %cst_33 : f32 to vector<256x16xf32>
    %62 = arith.minimumf %61, %60 : vector<256x16xf32>
    %63 = vector.shape_cast %62 : vector<256x16xf32> to vector<16x16x16xf32>
    %64 = arith.index_cast %48 : i32 to index
    %c1_34 = arith.constant 1 : index
    %c0_35 = arith.constant 0 : index
    %65 = vector.load %arg12[%64, %c1_34, %c0_35] : memref<20x18x16xf32, #tpu.memory_space<vmem>>, vector<16x16x16xf32>
    tpu.vector_store %arg12[%64, %c1_34, %c0_35], %63 {strides = array<i32>} : memref<20x18x16xf32, #tpu.memory_space<vmem>>, vector<16x16x16xf32>,
    %c0_i32_36 = arith.constant 0 : i32
    %c16_i32_37 = arith.constant 16 : i32
    %66 = arith.addi %c0_i32_36, %c16_i32_37 : i32
    %c1_i32_38 = arith.constant 1 : i32
    scf.for %arg14 = %c0_i32_36 to %66 step %c1_i32_38  : i32 {
      %cst_50 = arith.constant 0.000000e+00 : f32
      %82 = vector.broadcast %cst_50 : f32 to vector<16x16xf32>
      %c1_i32_51 = arith.constant 1 : i32
      %83 = arith.muli %c1_i32_51, %arg14 : i32
      %c0_i32_52 = arith.constant 0 : i32
      %84 = arith.addi %83, %c0_i32_52 : i32
      %c1_i32_53 = arith.constant 1 : i32
      %85 = arith.addi %84, %c1_i32_53 : i32
      %86 = arith.index_cast %85 : i32 to index
      %c0_54 = arith.constant 0 : index
      %c0_55 = arith.constant 0 : index
      %87 = vector.load %arg12[%86, %c0_54, %c0_55] : memref<20x18x16xf32, #tpu.memory_space<vmem>>, vector<1x18x16xf32>
      %88 = vector.shape_cast %87 : vector<1x18x16xf32> to vector<18x16xf32>
      %89 = vector.extract_strided_slice %88 {offsets = [0, 0], sizes = [16, 16], strides = [1, 1]} : vector<18x16xf32> to vector<16x16xf32>
      %90 = vector.broadcast %5 : vector<1x16xf32> to vector<16x16xf32>
      %91 = arith.mulf %89, %90 : vector<16x16xf32>
      %92 = arith.addf %82, %91 : vector<16x16xf32>
      %93 = vector.extract_strided_slice %88 {offsets = [1, 0], sizes = [16, 16], strides = [1, 1]} : vector<18x16xf32> to vector<16x16xf32>
      %94 = vector.broadcast %8 : vector<1x16xf32> to vector<16x16xf32>
      %95 = arith.mulf %93, %94 : vector<16x16xf32>
      %96 = arith.addf %92, %95 : vector<16x16xf32>
      %97 = vector.extract_strided_slice %88 {offsets = [2, 0], sizes = [16, 16], strides = [1, 1]} : vector<18x16xf32> to vector<16x16xf32>
      %98 = vector.broadcast %11 : vector<1x16xf32> to vector<16x16xf32>
      %99 = arith.mulf %97, %98 : vector<16x16xf32>
      %100 = arith.addf %96, %99 : vector<16x16xf32>
      %c1_i32_56 = arith.constant 1 : i32
      %101 = arith.muli %c1_i32_56, %arg14 : i32
      %c1_i32_57 = arith.constant 1 : i32
      %102 = arith.addi %101, %c1_i32_57 : i32
      %c1_i32_58 = arith.constant 1 : i32
      %103 = arith.addi %102, %c1_i32_58 : i32
      %104 = arith.index_cast %103 : i32 to index
      %c0_59 = arith.constant 0 : index
      %c0_60 = arith.constant 0 : index
      %105 = vector.load %arg12[%104, %c0_59, %c0_60] : memref<20x18x16xf32, #tpu.memory_space<vmem>>, vector<1x18x16xf32>
      %106 = vector.shape_cast %105 : vector<1x18x16xf32> to vector<18x16xf32>
      %107 = vector.extract_strided_slice %106 {offsets = [0, 0], sizes = [16, 16], strides = [1, 1]} : vector<18x16xf32> to vector<16x16xf32>
      %108 = vector.broadcast %14 : vector<1x16xf32> to vector<16x16xf32>
      %109 = arith.mulf %107, %108 : vector<16x16xf32>
      %110 = arith.addf %100, %109 : vector<16x16xf32>
      %111 = vector.extract_strided_slice %106 {offsets = [1, 0], sizes = [16, 16], strides = [1, 1]} : vector<18x16xf32> to vector<16x16xf32>
      %112 = vector.broadcast %17 : vector<1x16xf32> to vector<16x16xf32>
      %113 = arith.mulf %111, %112 : vector<16x16xf32>
      %114 = arith.addf %110, %113 : vector<16x16xf32>
      %115 = vector.extract_strided_slice %106 {offsets = [2, 0], sizes = [16, 16], strides = [1, 1]} : vector<18x16xf32> to vector<16x16xf32>
      %116 = vector.broadcast %20 : vector<1x16xf32> to vector<16x16xf32>
      %117 = arith.mulf %115, %116 : vector<16x16xf32>
      %118 = arith.addf %114, %117 : vector<16x16xf32>
      %c1_i32_61 = arith.constant 1 : i32
      %119 = arith.muli %c1_i32_61, %arg14 : i32
      %c2_i32 = arith.constant 2 : i32
      %120 = arith.addi %119, %c2_i32 : i32
      %c1_i32_62 = arith.constant 1 : i32
      %121 = arith.addi %120, %c1_i32_62 : i32
      %122 = arith.index_cast %121 : i32 to index
      %c0_63 = arith.constant 0 : index
      %c0_64 = arith.constant 0 : index
      %123 = vector.load %arg12[%122, %c0_63, %c0_64] : memref<20x18x16xf32, #tpu.memory_space<vmem>>, vector<1x18x16xf32>
      %124 = vector.shape_cast %123 : vector<1x18x16xf32> to vector<18x16xf32>
      %125 = vector.extract_strided_slice %124 {offsets = [0, 0], sizes = [16, 16], strides = [1, 1]} : vector<18x16xf32> to vector<16x16xf32>
      %126 = vector.broadcast %23 : vector<1x16xf32> to vector<16x16xf32>
      %127 = arith.mulf %125, %126 : vector<16x16xf32>
      %128 = arith.addf %118, %127 : vector<16x16xf32>
      %129 = vector.extract_strided_slice %124 {offsets = [1, 0], sizes = [16, 16], strides = [1, 1]} : vector<18x16xf32> to vector<16x16xf32>
      %130 = vector.broadcast %26 : vector<1x16xf32> to vector<16x16xf32>
      %131 = arith.mulf %129, %130 : vector<16x16xf32>
      %132 = arith.addf %128, %131 : vector<16x16xf32>
      %133 = vector.extract_strided_slice %124 {offsets = [2, 0], sizes = [16, 16], strides = [1, 1]} : vector<18x16xf32> to vector<16x16xf32>
      %134 = vector.broadcast %29 : vector<1x16xf32> to vector<16x16xf32>
      %135 = arith.mulf %133, %134 : vector<16x16xf32>
      %136 = arith.addf %132, %135 : vector<16x16xf32>
      %137 = vector.broadcast %30 : vector<1x16xf32> to vector<16x16xf32>
      %138 = arith.addf %136, %137 : vector<16x16xf32>
      %cst_65 = arith.constant 0.000000e+00 : f32
      %cst_66 = arith.constant 6.000000e+00 : f32
      %139 = vector.broadcast %cst_65 : f32 to vector<16x16xf32>
      %140 = arith.maximumf %139, %138 : vector<16x16xf32>
      %141 = vector.broadcast %cst_66 : f32 to vector<16x16xf32>
      %142 = arith.minimumf %141, %140 : vector<16x16xf32>
      %143 = arith.truncf %142 : vector<16x16xf32> to vector<16x16xbf16>
      %c16_i32_67 = arith.constant 16 : i32
      %144 = arith.muli %arg14, %c16_i32_67 : i32
      %145 = tpu.assume_multiple %144, 16 : i32
      %146 = arith.index_cast %145 : i32 to index
      %c0_68 = arith.constant 0 : index
      %147 = vector.load %arg13[%146, %c0_68] : memref<256x16xbf16, #tpu.memory_space<vmem>>, vector<16x16xbf16>
      tpu.vector_store %arg13[%146, %c0_68], %143 {strides = array<i32>} : memref<256x16xbf16, #tpu.memory_space<vmem>>, vector<16x16xbf16>,
    }
    %c16_i32_39 = arith.constant 16 : i32
    %c0_40 = arith.constant 0 : index
    %c0_41 = arith.constant 0 : index
    %67 = vector.load %arg13[%c0_40, %c0_41] : memref<256x16xbf16, #tpu.memory_space<vmem>>, vector<256x16xbf16>
    %cst_42 = arith.constant dense<0.000000e+00> : vector<256x8xf32>
    %68 = tpu.matmul %67, %31, %cst_42 {dimension_numbers = #tpu.dot_dimension_numbers<[1], [0], [0], [1], [0, 0, 1, 1], [], []>} : vector<256x16xbf16>, vector<16x8xbf16>, vector<256x8xf32> -> vector<256x8xf32>
    %69 = vector.broadcast %32 : vector<1x8xf32> to vector<256x8xf32>
    %70 = arith.mulf %68, %69 : vector<256x8xf32>
    %71 = vector.broadcast %33 : vector<1x8xf32> to vector<256x8xf32>
    %72 = arith.addf %70, %71 : vector<256x8xf32>
    %c0_43 = arith.constant 0 : index
    %73 = arith.index_cast %1 : i32 to index
    %c0_44 = arith.constant 0 : index
    %c0_45 = arith.constant 0 : index
    %74 = vector.load %arg2[%c0_43, %73, %c0_44, %c0_45] : memref<1x16x16x8xf32, #tpu.memory_space<vmem>>, vector<1x16x16x8xf32>
    %75 = vector.shape_cast %74 : vector<1x16x16x8xf32> to vector<16x16x8xf32>
    %76 = vector.shape_cast %75 : vector<16x16x8xf32> to vector<256x8xf32>
    %77 = arith.addf %72, %76 : vector<256x8xf32>
    %78 = vector.shape_cast %77 : vector<256x8xf32> to vector<16x16x8xf32>
    %c0_46 = arith.constant 0 : index
    %c0_47 = arith.constant 0 : index
    %c0_48 = arith.constant 0 : index
    %c0_49 = arith.constant 0 : index
    %79 = vector.load %arg11[%c0_46, %c0_47, %c0_48, %c0_49] : memref<1x16x16x8xf32, #tpu.memory_space<vmem>>, vector<1x16x16x8xf32>
    %80 = vector.shape_cast %79 : vector<1x16x16x8xf32> to vector<16x16x8xf32>
    %81 = vector.shape_cast %78 : vector<16x16x8xf32> to vector<1x16x16x8xf32>
    tpu.vector_store %arg11[%c0_46, %c0_47, %c0_48, %c0_49], %81 {strides = array<i32>} : memref<1x16x16x8xf32, #tpu.memory_space<vmem>>, vector<1x16x16x8xf32>,
    return
  }
  func.func @transform_0(%arg0: i32, %arg1: i32) -> (i32, i32, i32, i32) {
    %c0_i32 = arith.constant 0 : i32
    %c0_i32_0 = arith.constant 0 : i32
    %c0_i32_1 = arith.constant 0 : i32
    %c0_i32_2 = arith.constant 0 : i32
    return %arg0, %c0_i32, %c0_i32_0, %c0_i32_1 : i32, i32, i32, i32
  }
  func.func @transform_1(%arg0: i32, %arg1: i32) -> (i32, i32) {
    %c0_i32 = arith.constant 0 : i32
    %c0_i32_0 = arith.constant 0 : i32
    %c0_i32_1 = arith.constant 0 : i32
    return %c0_i32, %c0_i32_0 : i32, i32
  }
  func.func @transform_2(%arg0: i32, %arg1: i32) -> (i32, i32) {
    %c0_i32 = arith.constant 0 : i32
    %c0_i32_0 = arith.constant 0 : i32
    %c0_i32_1 = arith.constant 0 : i32
    return %c0_i32, %c0_i32_0 : i32, i32
  }
  func.func @transform_3(%arg0: i32, %arg1: i32) -> (i32, i32) {
    %c0_i32 = arith.constant 0 : i32
    %c0_i32_0 = arith.constant 0 : i32
    %c0_i32_1 = arith.constant 0 : i32
    return %c0_i32, %c0_i32_0 : i32, i32
  }
  func.func @transform_4(%arg0: i32, %arg1: i32) -> (i32, i32) {
    %c0_i32 = arith.constant 0 : i32
    %c0_i32_0 = arith.constant 0 : i32
    %c0_i32_1 = arith.constant 0 : i32
    return %c0_i32, %c0_i32_0 : i32, i32
  }
  func.func @transform_5(%arg0: i32, %arg1: i32) -> (i32, i32) {
    %c0_i32 = arith.constant 0 : i32
    %c0_i32_0 = arith.constant 0 : i32
    %c0_i32_1 = arith.constant 0 : i32
    return %c0_i32, %c0_i32_0 : i32, i32
  }
  func.func @transform_6(%arg0: i32, %arg1: i32) -> (i32, i32) {
    %c0_i32 = arith.constant 0 : i32
    %c0_i32_0 = arith.constant 0 : i32
    %c0_i32_1 = arith.constant 0 : i32
    return %c0_i32, %c0_i32_0 : i32, i32
  }
  func.func @transform_7(%arg0: i32, %arg1: i32) -> (i32, i32) {
    %c0_i32 = arith.constant 0 : i32
    %c0_i32_0 = arith.constant 0 : i32
    %c0_i32_1 = arith.constant 0 : i32
    return %c0_i32, %c0_i32_0 : i32, i32
  }
  func.func @transform_8(%arg0: i32, %arg1: i32) -> (i32, i32) {
    %c0_i32 = arith.constant 0 : i32
    %c0_i32_0 = arith.constant 0 : i32
    %c0_i32_1 = arith.constant 0 : i32
    return %c0_i32, %c0_i32_0 : i32, i32
  }
  func.func @transform_9(%arg0: i32, %arg1: i32) -> (i32, i32, i32, i32) {
    %c0_i32 = arith.constant 0 : i32
    %c0_i32_0 = arith.constant 0 : i32
    %c0_i32_1 = arith.constant 0 : i32
    return %arg0, %arg1, %c0_i32, %c0_i32_0 : i32, i32, i32, i32
  }
}

</mosaic_0001>

<bundles_post_ra>
// kernel: tpu_custom_call.1
= control target key start
LH: loop header
LB: loop body
LE: loop exit
PB: predicated region body
PF: predicated region fallthrough
CT: control target
= control target key end

     0   :  { %s1879_s30 = smov 0   ;;  %s1881_s10 = smov 0   ;;  %s2391_s0 = inlined_call_operand.vmem [shape: f32[2,16,16,8], index: 0, kind: input, shape index: {}]   ;;  %s2392_s1 = inlined_call_operand.vmem [shape: bf16[8,16], index: 1, kind: input, shape index: {}]   ;;  %s2393_s2 = inlined_call_operand.vmem [shape: f32[1,16], index: 2, kind: input, shape index: {}]   ;;  %s2394_s3 = inlined_call_operand.vmem [shape: f32[1,16], index: 3, kind: input, shape index: {}]   ;;  %s2395_s4 = inlined_call_operand.vmem [shape: f32[9,16], index: 4, kind: input, shape index: {}]   ;;  %s2396_s5 = inlined_call_operand.vmem [shape: f32[1,16], index: 5, kind: input, shape index: {}]   ;;  %s2397_s6 = inlined_call_operand.vmem [shape: bf16[16,8], index: 6, kind: input, shape index: {}]   ;;  %s2398_s7 = inlined_call_operand.vmem [shape: f32[1,8], index: 7, kind: input, shape index: {}]   ;;  %s2399_s8 = inlined_call_operand.vmem [shape: f32[1,8], index: 8, kind: input, shape index: {}]   ;;  %s2400_s9 = inlined_call_operand.vmem [shape: f32[2,16,16,8], index: 9, kind: output, shape index: {}]  }
   0x1   :  { %s1883_s11 = smov 0  }
   0x2 LB: > { %s31_s12 = sadd.s32 1, %s1818_s10  ;;  %p1568_p0 = scmp.ge.s32.totalorder %s1822_s11, 1  ;;  %s1822_s11 = sphi %s1883_s11, %s19_s11   ;;  %s1818_s10 = sphi %s1881_s10, %s2402_s10   ;;  %s1814_s30 = sphi %s1879_s30, %s2401_s30  }
   0x3   : > { %p33_p1 = scmp.ge.s32.totalorder %s31_s12, 2  ;;  %p301_p2 = scmp.lt.s32.totalorder %s1822_s11, 3 }
   0x5   : > { %s2404_s12 = smov (%p33_p1, %s31_s12), 0  ;;  %p302_p3 = pnand %p1568_p0, %p301_p2 }
   0x6   : > { %v1902_v0 = vld [vmem:[%s2395_s4] sm:$0xff] (!%p302_p3)  ;;  %v1907_v1 = vld [vmem:[%s2395_s4 + $0x8] ss:$0 sm:$0xff] (!%p302_p3)  ;;  %vm374_vm0 = vcmask (!%p302_p3), 123904   ;;  %vm380_vm1 = vcmask (!%p302_p3), 122880   ;;  %v1828_v8 = vmov (!%p302_p3), 0.0  }
   0x7   : > { %305 = sbr.rel (%p302_p3) target bundleno = 626 (0x272), region = 56  ;;  %v1912_v2 = vld [vmem:[%s2396_s5] ss:$0 sm:$0xff] (!%p302_p3)  ;;  %v1922_v4 = vld [vmem:[%s2397_s6 + $0x4] sm:$0xf] (!%p302_p3)  ;;  %vm527_vm2 = vcmask (!%p302_p3), 1043456  }
   0x8   : > { %v1917_v3 = vld [vmem:[%s2397_s6] sm:$0xf] (!%p302_p3)  ;;  %375 = vst.msk [vmem:[#allocation2 + $0x28] sm:$0x3] (!%p302_p3), %vm374_vm0, %v1828_v8  ;;  %379 = vst.msk [vmem:[#allocation2 + $0x1c0] sm:$0x3] (!%p302_p3), %vm374_vm0, %v1828_v8 }
   0x9   : > { %v1927_v5 = vld [vmem:[%s2398_s7] ss:$0 sm:$0xff] (!%p302_p3)  ;;  %381 = vst.msk [vmem:[#allocation2] sm:$0x1] (!%p302_p3), %vm380_vm1, %v1828_v8  ;;  %383 = vst.msk [vmem:[#allocation2 + $0x30] sm:$0x1] (!%p302_p3), %vm380_vm1, %v1828_v8 }
   0xa   : > { %v1932_v6 = vld [vmem:[%s2399_s8] ss:$0 sm:$0xff] (!%p302_p3)  ;;  %384 = vst.msk [vmem:[#allocation2 + $0x48] sm:$0x1] (!%p302_p3), %vm380_vm1, %v1828_v8  ;;  %385 = vst.msk [vmem:[#allocation2 + $0x60] sm:$0x1] (!%p302_p3), %vm380_vm1, %v1828_v8 }
   0xb   : > { %v367_v7 = vld [vmem:[%s2392_s1] sm:$0xf] (!%p302_p3)  ;;  %386 = vst.msk [vmem:[#allocation2 + $0x78] sm:$0x1] (!%p302_p3), %vm380_vm1, %v1828_v8  ;;  %387 = vst.msk [vmem:[#allocation2 + $0x90] sm:$0x1] (!%p302_p3), %vm380_vm1, %v1828_v8 }
   0xc   : > { %388 = vst.msk [vmem:[#allocation2 + $0xa8] sm:$0x1] (!%p302_p3), %vm380_vm1, %v1828_v8  ;;  %389 = vst.msk [vmem:[#allocation2 + $0xc0] sm:$0x1] (!%p302_p3), %vm380_vm1, %v1828_v8  ;;  %p342_p4 = scmp.lt.s32.totalorder (!%p302_p3), %s1814_s30, 1  ;;  %vm371_vm3 = vcmask (!%p302_p3), 130048   ;;  %1762 = vmatprep.subr.msk.bf16.mxu0 (!%p302_p3), %vm527_vm2, %v367_v7 }
   0xd   : > { %390 = vst.msk [vmem:[#allocation2 + $0xd8] sm:$0x1] (!%p302_p3), %vm380_vm1, %v1828_v8  ;;  %391 = vst.msk [vmem:[#allocation2 + $0xf0] sm:$0x1] (!%p302_p3), %vm380_vm1, %v1828_v8  ;;  %v529_v9 = vsel (!%p302_p3), %vm527_vm2, %v367_v7, 0  ;;  %vm478_vm4 = vcmask (!%p302_p3), 64512  }
   0xe   : > { %392 = vst.msk [vmem:[#allocation2 + $0x108] sm:$0x1] %vm380_vm1, %v1828_v8  ;;  %393 = vst.msk [vmem:[#allocation2 + $0x120] sm:$0x1] %vm380_vm1, %v1828_v8  ;;  %1695 = vmatpush3.bf16.msra.mxu0 %v529_v9  ;;  %s2406_s30 = smov (!%p342_p4, %s1814_s30), 1  ;;  %s2147_s22 = smov 0  }
   0xf   : > { %394 = vst.msk [vmem:[#allocation2 + $0x138] sm:$0x1] %vm380_vm1, %v1828_v8  ;;  %395 = vst.msk [vmem:[#allocation2 + $0x150] sm:$0x1] %vm380_vm1, %v1828_v8  ;;  %s1658_s29 = sshll.u32 %s2406_s30, 8 }
  0x10   : > { %396 = vst.msk [vmem:[#allocation2 + $0x168] sm:$0x1] %vm380_vm1, %v1828_v8  ;;  %397 = vst.msk [vmem:[#allocation2 + $0x180] sm:$0x1] %vm380_vm1, %v1828_v8  ;;  %s1986_s15 = scalar_lea.vmem %s2391_s0, %s1658_s29  ;;  %s1991_s18 = scalar_lea.vmem %s2400_s9, %s1658_s29  ;;  %v2044_v58 = vld [vmem:[%s2393_s2] ss:$0 sm:$0xff] }
  0x11   : > { %398 = vst.msk [vmem:[#allocation2 + $0x198] sm:$0x1] %vm380_vm1, %v1828_v8  ;;  %400 = vst.msk [vmem:[#allocation2 + $0x1c8] sm:$0x1] %vm380_vm1, %v1828_v8  ;;  %v430_v10 = vld [vmem:[%s1986_s15] sm:$0xff]  ;;  %v431_v11 = vld [vmem:[%s1986_s15 + $0x8] sm:$0xff] }
  0x12   : > { %401 = vst.msk [vmem:[#allocation2 + $0x11] sm:$0x1] %vm380_vm1, %v1828_v8  ;;  %403 = vst.msk [vmem:[#allocation2 + $0x41] sm:$0x1] %vm380_vm1, %v1828_v8  ;;  %v432_v12 = vld [vmem:[%s1986_s15 + $0x10] sm:$0xff]  ;;  %v462_v13 = vpack.c.bf16 %v431_v11, %v430_v10  ;;  %v433_v14 = vld [vmem:[%s1986_s15 + $0x18] sm:$0xff] }
  0x13   : > { %404 = vst.msk [vmem:[#allocation2 + $0x59] sm:$0x1] %vm380_vm1, %v1828_v8  ;;  %405 = vst.msk [vmem:[#allocation2 + $0x71] sm:$0x1] %vm380_vm1, %v1828_v8  ;;  %v434_v15 = vld [vmem:[%s1986_s15 + $0x20] sm:$0xff]  ;;  %v435_v16 = vld [vmem:[%s1986_s15 + $0x28] sm:$0xff]  ;;  %v463_v17 = vpack.c.bf16 %v433_v14, %v432_v12 }
  0x14   : > { %406 = vst.msk [vmem:[#allocation2 + $0x89] sm:$0x1] %vm380_vm1, %v1828_v8  ;;  %407 = vst.msk [vmem:[#allocation2 + $0xa1] sm:$0x1] %vm380_vm1, %v1828_v8  ;;  %v464_v18 = vpack.c.bf16 %v435_v16, %v434_v15  ;;  %1696 = vmatprep.mubr.msk.bf16.mxu0 %vm478_vm4, %v462_v13  ;;  %v436_v19 = vld [vmem:[%s1986_s15 + $0x30] sm:$0xff]  ;;  %v437_v20 = vld [vmem:[%s1986_s15 + $0x38] sm:$0xff] }
  0x15   : > { %408 = vst.msk [vmem:[#allocation2 + $0xb9] sm:$0x1] %vm380_vm1, %v1828_v8  ;;  %409 = vst.msk [vmem:[#allocation2 + $0xd1] sm:$0x1] %vm380_vm1, %v1828_v8  ;;  %1697 = vmatmul.mubr.msk.bf16.vlgmr.msra.gmra.mrb[0].mxu0 %vm478_vm4, %v463_v17  ;;  %v438_v21 = vld [vmem:[%s1986_s15 + $0x40] sm:$0xff]  ;;  %v439_v22 = vld [vmem:[%s1986_s15 + $0x48] sm:$0xff]  ;;  %v465_v23 = vpack.c.bf16 %v437_v20, %v436_v19 }
  0x16   : > { %410 = vst.msk [vmem:[#allocation2 + $0xe9] sm:$0x1] %vm380_vm1, %v1828_v8  ;;  %411 = vst.msk [vmem:[#allocation2 + $0x101] sm:$0x1] %vm380_vm1, %v1828_v8  ;;  %1700 = vmatprep.mubr.msk.bf16.mxu0 %vm478_vm4, %v464_v18  ;;  %v466_v24 = vpack.c.bf16 %v439_v22, %v438_v21  ;;  %v440_v25 = vld [vmem:[%s1986_s15 + $0x50] sm:$0xff]  ;;  %v441_v26 = vld [vmem:[%s1986_s15 + $0x58] sm:$0xff] }
  0x17   : > { %412 = vst.msk [vmem:[#allocation2 + $0x119] sm:$0x1] %vm380_vm1, %v1828_v8  ;;  %413 = vst.msk [vmem:[#allocation2 + $0x131] sm:$0x1] %vm380_vm1, %v1828_v8  ;;  %v442_v27 = vld [vmem:[%s1986_s15 + $0x60] sm:$0xff]  ;;  %v443_v28 = vld [vmem:[%s1986_s15 + $0x68] sm:$0xff]  ;;  %v467_v29 = vpack.c.bf16 %v441_v26, %v440_v25 }
  0x18   : > { %414 = vst.msk [vmem:[#allocation2 + $0x149] sm:$0x1] %vm380_vm1, %v1828_v8  ;;  %415 = vst.msk [vmem:[#allocation2 + $0x161] sm:$0x1] %vm380_vm1, %v1828_v8  ;;  %v468_v30 = vpack.c.bf16 %v443_v28, %v442_v27  ;;  %v444_v31 = vld [vmem:[%s1986_s15 + $0x70] sm:$0xff]  ;;  %v445_v32 = vld [vmem:[%s1986_s15 + $0x78] sm:$0xff] }
  0x19   : > { %416 = vst.msk [vmem:[#allocation2 + $0x179] sm:$0x1] %vm380_vm1, %v1828_v8  ;;  %417 = vst.msk [vmem:[#allocation2 + $0x191] sm:$0x1] %vm380_vm1, %v1828_v8  ;;  %v446_v33 = vld [vmem:[%s1986_s15 + $0x80] sm:$0xff]  ;;  %v447_v34 = vld [vmem:[%s1986_s15 + $0x88] sm:$0xff]  ;;  %v469_v35 = vpack.c.bf16 %v445_v32, %v444_v31 }
  0x1a   : > { %418 = vst.msk [vmem:[#allocation2 + $0x1a9] sm:$0x1] %vm380_vm1, %v1828_v8  ;;  %420 = vst.msk [vmem:[#allocation2 + $0x1d9] sm:$0x1] %vm380_vm1, %v1828_v8  ;;  %v470_v36 = vpack.c.bf16 %v447_v34, %v446_v33  ;;  %v448_v37 = vld [vmem:[%s1986_s15 + $0x90] sm:$0xff]  ;;  %v449_v38 = vld [vmem:[%s1986_s15 + $0x98] sm:$0xff] }
  0x1b   : > { %402 = vst.msk [vmem:[#allocation2 + $0x29] sm:$0x1] %vm380_vm1, %v1828_v8  ;;  %419 = vst.msk [vmem:[#allocation2 + $0x1c1] sm:$0x1] %vm380_vm1, %v1828_v8  ;;  %v450_v39 = vld [vmem:[%s1986_s15 + $0xa0] sm:$0xff]  ;;  %v451_v40 = vld [vmem:[%s1986_s15 + $0xa8] sm:$0xff]  ;;  %v471_v41 = vpack.c.bf16 %v449_v38, %v448_v37 }
  0x1c   : > { %372 = vst.msk [vmem:[#allocation2 + $0x18] sm:$0xff] %vm371_vm3, %v1828_v8  ;;  %373 = vst.msk [vmem:[#allocation2 + $0x20] sm:$0xff] %vm371_vm3, %v1828_v8  ;;  %v472_v42 = vpack.c.bf16 %v451_v40, %v450_v39  ;;  %v452_v43 = vld [vmem:[%s1986_s15 + $0xb0] sm:$0xff]  ;;  %v453_v44 = vld [vmem:[%s1986_s15 + $0xb8] sm:$0xff] }
  0x1d   : > { %377 = vst.msk [vmem:[#allocation2 + $0x1b0] sm:$0xff] %vm371_vm3, %v1828_v8  ;;  %378 = vst.msk [vmem:[#allocation2 + $0x1b8] sm:$0xff] %vm371_vm3, %v1828_v8  ;;  %1701 = vmatmul.mubr.msk.bf16.gmra.mrb[4].mxu0 %vm478_vm4, %v465_v23  ;;  %v454_v45 = vld [vmem:[%s1986_s15 + $0xc0] sm:$0xff]  ;;  %v455_v46 = vld [vmem:[%s1986_s15 + $0xc8] sm:$0xff]  ;;  %v473_v47 = vpack.c.bf16 %v453_v44, %v452_v43 }
  0x1e   : > { %382 = vst.msk [vmem:[#allocation2 + $0x18] sm:$0x1] %vm380_vm1, %v1828_v8  ;;  %399 = vst.msk [vmem:[#allocation2 + $0x1b0] sm:$0x1] %vm380_vm1, %v1828_v8  ;;  %1704 = vmatprep.mubr.msk.bf16.mxu0 %vm478_vm4, %v466_v24  ;;  %v474_v48 = vpack.c.bf16 %v455_v46, %v454_v45  ;;  %v456_v49 = vld [vmem:[%s1986_s15 + $0xd0] sm:$0xff]  ;;  %v457_v50 = vld [vmem:[%s1986_s15 + $0xd8] sm:$0xff] }
  0x1f   : > { %v458_v51 = vld [vmem:[%s1986_s15 + $0xe0] sm:$0xff]  ;;  %v459_v52 = vld [vmem:[%s1986_s15 + $0xe8] sm:$0xff]  ;;  %v475_v53 = vpack.c.bf16 %v457_v50, %v456_v49  ;;  %v460_v55 = vld [vmem:[%s1986_s15 + $0xf0] sm:$0xff] }
  0x20   : > { %v476_v54 = vpack.c.bf16 %v459_v52, %v458_v51  ;;  %v461_v56 = vld [vmem:[%s1986_s15 + $0xf8] sm:$0xff]  ;;  %v2049_v59 = vld [vmem:[%s2394_s3] ss:$0 sm:$0xff] }
  0x21   : > { %v477_v57 = vpack.c.bf16 %v461_v56, %v460_v55 }
  0x25   : > { %1705 = vmatmul.mubr.msk.bf16.gmra.mrb[8].mxu0 %vm478_vm4, %v467_v29 }
  0x26   : > { %1708 = vmatprep.mubr.msk.bf16.mxu0 %vm478_vm4, %v468_v30 }
  0x2d   : > { %1709 = vmatmul.mubr.msk.bf16.gmra.mrb[12].mxu0 %vm478_vm4, %v469_v35 }
  0x2e   : > { %1712 = vmatprep.mubr.msk.bf16.mxu0 %vm478_vm4, %v470_v36 }
  0x35   : > { %1713 = vmatmul.mubr.msk.bf16.gmra.mrb[16].mxu0 %vm478_vm4, %v471_v41 }
  0x36   : > { %1716 = vmatprep.mubr.msk.bf16.mxu0 %vm478_vm4, %v472_v42 }
  0x3d   : > { %1717 = vmatmul.mubr.msk.bf16.gmra.mrb[20].mxu0 %vm478_vm4, %v473_v47 }
  0x3e   : > { %1720 = vmatprep.mubr.msk.bf16.mxu0 %vm478_vm4, %v474_v48 }
  0x45   : > { %1721 = vmatmul.mubr.msk.bf16.gmra.mrb[24].mxu0 %vm478_vm4, %v475_v53 }
  0x46   : > { %1724 = vmatprep.mubr.msk.bf16.mxu0 %vm478_vm4, %v476_v54 }
  0x4d   : > { %1725 = vmatmul.mubr.msk.bf16.gmra.mrb[28].mxu0 %vm478_vm4, %v477_v57 }
  0xe8   : > { %v1698_v60 = vpop.f32.mrb[0].mxu0 }
  0xe9   : > { %v700_v61 = vmul.f32 %v1698_v60, %v2044_v58  ;;  %v565_v62 = vpop.f32.mrb[1].mxu0 }
  0xea   : > { %v698_v63 = vmul.f32 %v2044_v58, %v565_v62  ;;  %v1699_v7 = vpop.f32.mrb[2].mxu0 }
  0xeb   : > { %v738_v8 = vadd.f32 %v2049_v59, %v700_v61  ;;  %v701_v9 = vmul.f32 %v1699_v7, %v2044_v58  ;;  %v568_v10 = vpop.f32.mrb[3].mxu0 }
  0xec   : > { %v736_v11 = vadd.f32 %v2049_v59, %v698_v63  ;;  %v699_v12 = vmul.f32 %v2044_v58, %v568_v10 }
  0xed   : > { %v770_v13 = vmax.f32 %v738_v8, 0.0  ;;  %v739_v14 = vadd.f32 %v2049_v59, %v701_v9 }
  0xee   : > { %v768_v15 = vmax.f32 %v736_v11, 0.0  ;;  %v737_v16 = vadd.f32 %v2049_v59, %v699_v12 }
  0xef   : > { %v802_v17 = vmin.f32 %v770_v13, 6.0  ;;  %v771_v18 = vmax.f32 %v739_v14, 0.0 }
  0xf0   : > { %v800_v19 = vmin.f32 %v768_v15, 6.0  ;;  %v769_v20 = vmax.f32 %v737_v16, 0.0  ;;  %v1702_v21 = vpop.f32.mrb[4].mxu0 }
  0xf1   : > { %1594 = vst.msk [vmem:[#allocation2 + $0x49] sm:$0xff] %vm371_vm3, %v802_v17  ;;  %v803_v22 = vmin.f32 %v771_v18, 6.0  ;;  %v704_v23 = vmul.f32 %v1702_v21, %v2044_v58  ;;  %v581_v24 = vpop.f32.mrb[5].mxu0 }
  0xf2   : > { %1592 = vst.msk [vmem:[#allocation2 + $0x31] sm:$0xff] %vm371_vm3, %v800_v19  ;;  %v801_v25 = vmin.f32 %v769_v20, 6.0  ;;  %v702_v26 = vmul.f32 %v2044_v58, %v581_v24  ;;  %v1703_v27 = vpop.f32.mrb[6].mxu0 }
  0xf3   : > { %1595 = vst.msk [vmem:[#allocation2 + $0x51] sm:$0xff] %vm371_vm3, %v803_v22  ;;  %v742_v28 = vadd.f32 %v2049_v59, %v704_v23  ;;  %v705_v29 = vmul.f32 %v1703_v27, %v2044_v58  ;;  %v584_v30 = vpop.f32.mrb[7].mxu0 }
  0xf4   : > { %1593 = vst.msk [vmem:[#allocation2 + $0x39] sm:$0xff] %vm371_vm3, %v801_v25  ;;  %v740_v31 = vadd.f32 %v2049_v59, %v702_v26  ;;  %v703_v32 = vmul.f32 %v2044_v58, %v584_v30 }
  0xf5   : > { %v774_v33 = vmax.f32 %v742_v28, 0.0  ;;  %v743_v34 = vadd.f32 %v2049_v59, %v705_v29 }
  0xf6   : > { %v772_v35 = vmax.f32 %v740_v31, 0.0  ;;  %v741_v36 = vadd.f32 %v2049_v59, %v703_v32 }
  0xf7   : > { %v806_v37 = vmin.f32 %v774_v33, 6.0  ;;  %v775_v38 = vmax.f32 %v743_v34, 0.0 }
  0xf8   : > { %v804_v39 = vmin.f32 %v772_v35, 6.0  ;;  %v773_v40 = vmax.f32 %v741_v36, 0.0  ;;  %v1706_v41 = vpop.f32.mrb[8].mxu0 }
  0xf9   : > { %1598 = vst.msk [vmem:[#allocation2 + $0x79] sm:$0xff] %vm371_vm3, %v806_v37  ;;  %v807_v42 = vmin.f32 %v775_v38, 6.0  ;;  %v708_v43 = vmul.f32 %v1706_v41, %v2044_v58  ;;  %v597_v44 = vpop.f32.mrb[9].mxu0 }
  0xfa   : > { %1596 = vst.msk [vmem:[#allocation2 + $0x61] sm:$0xff] %vm371_vm3, %v804_v39  ;;  %v805_v45 = vmin.f32 %v773_v40, 6.0  ;;  %v706_v46 = vmul.f32 %v2044_v58, %v597_v44  ;;  %v1707_v47 = vpop.f32.mrb[10].mxu0 }
  0xfb   : > { %1599 = vst.msk [vmem:[#allocation2 + $0x81] sm:$0xff] %vm371_vm3, %v807_v42  ;;  %v746_v48 = vadd.f32 %v2049_v59, %v708_v43  ;;  %v709_v49 = vmul.f32 %v1707_v47, %v2044_v58  ;;  %v600_v50 = vpop.f32.mrb[11].mxu0 }
  0xfc   : > { %1597 = vst.msk [vmem:[#allocation2 + $0x69] sm:$0xff] %vm371_vm3, %v805_v45  ;;  %v744_v51 = vadd.f32 %v2049_v59, %v706_v46  ;;  %v707_v52 = vmul.f32 %v2044_v58, %v600_v50 }
  0xfd   : > { %v778_v53 = vmax.f32 %v746_v48, 0.0  ;;  %v747_v54 = vadd.f32 %v2049_v59, %v709_v49 }
  0xfe   : > { %v776_v55 = vmax.f32 %v744_v51, 0.0  ;;  %v745_v56 = vadd.f32 %v2049_v59, %v707_v52 }
  0xff   : > { %v810_v57 = vmin.f32 %v778_v53, 6.0  ;;  %v779_v60 = vmax.f32 %v747_v54, 0.0 }
 0x100   : > { %v808_v61 = vmin.f32 %v776_v55, 6.0  ;;  %v777_v62 = vmax.f32 %v745_v56, 0.0  ;;  %v1710_v63 = vpop.f32.mrb[12].mxu0 }
 0x101   : > { %1602 = vst.msk [vmem:[#allocation2 + $0xa9] sm:$0xff] %vm371_vm3, %v810_v57  ;;  %v811_v7 = vmin.f32 %v779_v60, 6.0  ;;  %v712_v8 = vmul.f32 %v1710_v63, %v2044_v58  ;;  %v613_v9 = vpop.f32.mrb[13].mxu0 }
 0x102   : > { %1600 = vst.msk [vmem:[#allocation2 + $0x91] sm:$0xff] %vm371_vm3, %v808_v61  ;;  %v809_v10 = vmin.f32 %v777_v62, 6.0  ;;  %v710_v11 = vmul.f32 %v2044_v58, %v613_v9  ;;  %v1711_v12 = vpop.f32.mrb[14].mxu0 }
 0x103   : > { %1603 = vst.msk [vmem:[#allocation2 + $0xb1] sm:$0xff] %vm371_vm3, %v811_v7  ;;  %v750_v13 = vadd.f32 %v2049_v59, %v712_v8  ;;  %v713_v14 = vmul.f32 %v1711_v12, %v2044_v58  ;;  %v616_v15 = vpop.f32.mrb[15].mxu0 }
 0x104   : > { %1601 = vst.msk [vmem:[#allocation2 + $0x99] sm:$0xff] %vm371_vm3, %v809_v10  ;;  %v748_v16 = vadd.f32 %v2049_v59, %v710_v11  ;;  %v711_v17 = vmul.f32 %v2044_v58, %v616_v15 }
 0x105   : > { %v782_v18 = vmax.f32 %v750_v13, 0.0  ;;  %v751_v19 = vadd.f32 %v2049_v59, %v713_v14 }
 0x106   : > { %v780_v20 = vmax.f32 %v748_v16, 0.0  ;;  %v749_v21 = vadd.f32 %v2049_v59, %v711_v17 }
 0x107   : > { %v814_v22 = vmin.f32 %v782_v18, 6.0  ;;  %v783_v23 = vmax.f32 %v751_v19, 0.0 }
 0x108   : > { %v812_v24 = vmin.f32 %v780_v20, 6.0  ;;  %v781_v25 = vmax.f32 %v749_v21, 0.0  ;;  %v1714_v26 = vpop.f32.mrb[16].mxu0 }
 0x109   : > { %1606 = vst.msk [vmem:[#allocation2 + $0xd9] sm:$0xff] %vm371_vm3, %v814_v22  ;;  %v815_v27 = vmin.f32 %v783_v23, 6.0  ;;  %v716_v28 = vmul.f32 %v1714_v26, %v2044_v58  ;;  %v629_v29 = vpop.f32.mrb[17].mxu0 }
 0x10a   : > { %1604 = vst.msk [vmem:[#allocation2 + $0xc1] sm:$0xff] %vm371_vm3, %v812_v24  ;;  %v813_v30 = vmin.f32 %v781_v25, 6.0  ;;  %v714_v31 = vmul.f32 %v2044_v58, %v629_v29  ;;  %v1715_v32 = vpop.f32.mrb[18].mxu0 }
 0x10b   : > { %1607 = vst.msk [vmem:[#allocation2 + $0xe1] sm:$0xff] %vm371_vm3, %v815_v27  ;;  %v754_v33 = vadd.f32 %v2049_v59, %v716_v28  ;;  %v717_v34 = vmul.f32 %v1715_v32, %v2044_v58  ;;  %v632_v35 = vpop.f32.mrb[19].mxu0 }
 0x10c   : > { %1605 = vst.msk [vmem:[#allocation2 + $0xc9] sm:$0xff] %vm371_vm3, %v813_v30  ;;  %v752_v36 = vadd.f32 %v2049_v59, %v714_v31  ;;  %v715_v37 = vmul.f32 %v2044_v58, %v632_v35 }
 0x10d   : > { %v786_v38 = vmax.f32 %v754_v33, 0.0  ;;  %v755_v39 = vadd.f32 %v2049_v59, %v717_v34 }
 0x10e   : > { %v784_v40 = vmax.f32 %v752_v36, 0.0  ;;  %v753_v41 = vadd.f32 %v2049_v59, %v715_v37 }
 0x10f   : > { %v818_v42 = vmin.f32 %v786_v38, 6.0  ;;  %v787_v43 = vmax.f32 %v755_v39, 0.0 }
 0x110   : > { %v816_v44 = vmin.f32 %v784_v40, 6.0  ;;  %v785_v45 = vmax.f32 %v753_v41, 0.0  ;;  %v1718_v46 = vpop.f32.mrb[20].mxu0 }
 0x111   : > { %1610 = vst.msk [vmem:[#allocation2 + $0x109] sm:$0xff] %vm371_vm3, %v818_v42  ;;  %v819_v47 = vmin.f32 %v787_v43, 6.0  ;;  %v720_v48 = vmul.f32 %v1718_v46, %v2044_v58  ;;  %v645_v49 = vpop.f32.mrb[21].mxu0 }
 0x112   : > { %1608 = vst.msk [vmem:[#allocation2 + $0xf1] sm:$0xff] %vm371_vm3, %v816_v44  ;;  %v817_v50 = vmin.f32 %v785_v45, 6.0  ;;  %v718_v51 = vmul.f32 %v2044_v58, %v645_v49  ;;  %v1719_v52 = vpop.f32.mrb[22].mxu0 }
 0x113   : > { %1611 = vst.msk [vmem:[#allocation2 + $0x111] sm:$0xff] %vm371_vm3, %v819_v47  ;;  %v758_v53 = vadd.f32 %v2049_v59, %v720_v48  ;;  %v721_v54 = vmul.f32 %v1719_v52, %v2044_v58  ;;  %v648_v55 = vpop.f32.mrb[23].mxu0 }
 0x114   : > { %1609 = vst.msk [vmem:[#allocation2 + $0xf9] sm:$0xff] %vm371_vm3, %v817_v50  ;;  %v756_v56 = vadd.f32 %v2049_v59, %v718_v51  ;;  %v719_v57 = vmul.f32 %v2044_v58, %v648_v55 }
 0x115   : > { %v790_v60 = vmax.f32 %v758_v53, 0.0  ;;  %v759_v61 = vadd.f32 %v2049_v59, %v721_v54 }
 0x116   : > { %v788_v62 = vmax.f32 %v756_v56, 0.0  ;;  %v757_v63 = vadd.f32 %v2049_v59, %v719_v57 }
 0x117   : > { %v822_v7 = vmin.f32 %v790_v60, 6.0  ;;  %v791_v8 = vmax.f32 %v759_v61, 0.0 }
 0x118   : > { %v820_v9 = vmin.f32 %v788_v62, 6.0  ;;  %v789_v10 = vmax.f32 %v757_v63, 0.0  ;;  %v1722_v11 = vpop.f32.mrb[24].mxu0 }
 0x119   : > { %1614 = vst.msk [vmem:[#allocation2 + $0x139] sm:$0xff] %vm371_vm3, %v822_v7  ;;  %v823_v12 = vmin.f32 %v791_v8, 6.0  ;;  %v724_v13 = vmul.f32 %v1722_v11, %v2044_v58  ;;  %v661_v14 = vpop.f32.mrb[25].mxu0 }
 0x11a   : > { %1612 = vst.msk [vmem:[#allocation2 + $0x121] sm:$0xff] %vm371_vm3, %v820_v9  ;;  %v821_v15 = vmin.f32 %v789_v10, 6.0  ;;  %v722_v16 = vmul.f32 %v2044_v58, %v661_v14  ;;  %v1723_v17 = vpop.f32.mrb[26].mxu0 }
 0x11b   : > { %1615 = vst.msk [vmem:[#allocation2 + $0x141] sm:$0xff] %vm371_vm3, %v823_v12  ;;  %v762_v18 = vadd.f32 %v2049_v59, %v724_v13  ;;  %v725_v19 = vmul.f32 %v1723_v17, %v2044_v58  ;;  %v664_v20 = vpop.f32.mrb[27].mxu0 }
 0x11c   : > { %1613 = vst.msk [vmem:[#allocation2 + $0x129] sm:$0xff] %vm371_vm3, %v821_v15  ;;  %v760_v21 = vadd.f32 %v2049_v59, %v722_v16  ;;  %v723_v22 = vmul.f32 %v2044_v58, %v664_v20 }
 0x11d   : > { %v794_v23 = vmax.f32 %v762_v18, 0.0  ;;  %v763_v24 = vadd.f32 %v2049_v59, %v725_v19 }
 0x11e   : > { %v792_v25 = vmax.f32 %v760_v21, 0.0  ;;  %v761_v26 = vadd.f32 %v2049_v59, %v723_v22 }
 0x11f   : > { %v826_v27 = vmin.f32 %v794_v23, 6.0  ;;  %v795_v28 = vmax.f32 %v763_v24, 0.0 }
 0x120   : > { %v824_v29 = vmin.f32 %v792_v25, 6.0  ;;  %v793_v30 = vmax.f32 %v761_v26, 0.0  ;;  %v1726_v31 = vpop.f32.mrb[28].mxu0 }
 0x121   : > { %1618 = vst.msk [vmem:[#allocation2 + $0x169] sm:$0xff] %vm371_vm3, %v826_v27  ;;  %v827_v32 = vmin.f32 %v795_v28, 6.0  ;;  %v728_v33 = vmul.f32 %v1726_v31, %v2044_v58  ;;  %v677_v34 = vpop.f32.mrb[29].mxu0 }
 0x122   : > { %1616 = vst.msk [vmem:[#allocation2 + $0x151] sm:$0xff] %vm371_vm3, %v824_v29  ;;  %v825_v35 = vmin.f32 %v793_v30, 6.0  ;;  %v726_v36 = vmul.f32 %v2044_v58, %v677_v34  ;;  %v1727_v37 = vpop.f32.mrb[30].mxu0 }
 0x123   : > { %1619 = vst.msk [vmem:[#allocation2 + $0x171] sm:$0xff] %vm371_vm3, %v827_v32  ;;  %v766_v38 = vadd.f32 %v2049_v59, %v728_v33  ;;  %v729_v39 = vmul.f32 %v1727_v37, %v2044_v58  ;;  %v680_v40 = vpop.f32.mrb[31].mxu0 }
 0x124   : > { %1617 = vst.msk [vmem:[#allocation2 + $0x159] sm:$0xff] %vm371_vm3, %v825_v35  ;;  %v764_v41 = vadd.f32 %v2049_v59, %v726_v36  ;;  %v727_v42 = vmul.f32 %v2044_v58, %v680_v40 }
 0x125   : > { %v798_v43 = vmax.f32 %v766_v38, 0.0  ;;  %v767_v44 = vadd.f32 %v2049_v59, %v729_v39 }
 0x126   : > { %v796_v45 = vmax.f32 %v764_v41, 0.0  ;;  %v765_v46 = vadd.f32 %v2049_v59, %v727_v42 }
 0x127   : > { %v830_v47 = vmin.f32 %v798_v43, 6.0  ;;  %v799_v48 = vmax.f32 %v767_v44, 0.0 }
 0x128   : > { %v828_v49 = vmin.f32 %v796_v45, 6.0  ;;  %v797_v50 = vmax.f32 %v765_v46, 0.0 }
 0x129   : > { %1622 = vst.msk [vmem:[#allocation2 + $0x199] sm:$0xff] %vm371_vm3, %v830_v47  ;;  %v831_v51 = vmin.f32 %v799_v48, 6.0 }
 0x12a   : > { %1620 = vst.msk [vmem:[#allocation2 + $0x181] sm:$0xff] %vm371_vm3, %v828_v49  ;;  %v829_v52 = vmin.f32 %v797_v50, 6.0 }
 0x12b   : > { %1623 = vst.msk [vmem:[#allocation2 + $0x1a1] sm:$0xff] %vm371_vm3, %v831_v51 }
 0x12c   : > { %1621 = vst.msk [vmem:[#allocation2 + $0x189] sm:$0xff] %vm371_vm3, %v829_v52 }
 0x12d LB: >> { %v878_v58 = vlaneseq  ;;  %s1507_s23 = smul.u32 24, %s1826_s22  ;;  %vm896_vm5 = vcmask 1046528   ;;  %vm916_vm6 = vcmask 1045504   ;;  %s1635_s25 = sshll.u32 %s1826_s22, 4  ;;  %s1826_s22 = sphi %s2147_s22, %s871_s22  }
 0x12e   : >> { %s1044_s26 = sshra.s32 %s1635_s25, 4  ;;  %s871_s22 = sadd.s32 1, %s1826_s22  }
 0x12f   : >> { %v2153_v59 = vshrl.u32 %v878_v58, 7  ;;  %s2159_s24 = scalar_lea.vmem [#allocation2], %s1507_s23  ;;  %s1636_s27 = sshll.u32 %s1044_s26, 3 }
 0x130   : >> { %s1047_s28 = scalar_lea.vmem [#allocation3], %s1636_s27  ;;  %p868_p5 = scmp.ge.s32.totalorder %s871_s22, 16  }
 0x131   : >> { %v880_v53 = vsub.s32 0, %v2153_v59  ;;  %v888_v54 = vsub.s32 1, %v2153_v59  ;;  %v908_v55 = vsub.s32 2, %v2153_v59  ;;  %v934_v56 = vsub.s32 3, %v2153_v59 }
 0x132   : >> { %v942_v61 = vsub.s32 4, %v2153_v59  ;;  %v961_v62 = vsub.s32 5, %v2153_v59  ;;  %v986_v15 = vsub.s32 6, %v2153_v59  ;;  %v994_v16 = vsub.s32 7, %v2153_v59 }
 0x133   : >> { %v1624_v57 = vld [vmem:[%s2159_s24 + $0x18] sm:$0xff]  ;;  %v1625_v60 = vld [vmem:[%s2159_s24 + $0x20] sm:$0xff]  ;;  %v1626_v63 = vld [vmem:[%s2159_s24 + $0x28] sm:$0x3]  ;;  %v881_v7 = vrot.slane %v1902_v0, %v880_v53  ;;  %v889_v8 = vrot.slane %v1902_v0, %v888_v54  ;;  %v909_v9 = vrot.slane %v1902_v0, %v908_v55  ;;  %v935_v10 = vrot.slane %v1902_v0, %v934_v56 }
 0x134   : >> { %v1627_v11 = vld [vmem:[%s2159_s24 + $0x30] sm:$0xff]  ;;  %v1628_v12 = vld [vmem:[%s2159_s24 + $0x38] sm:$0xff]  ;;  %v943_v13 = vrot.slane %v1902_v0, %v942_v61  ;;  %v962_v14 = vrot.slane %v1902_v0, %v961_v62  ;;  %v1629_v25 = vld [vmem:[%s2159_s24 + $0x40] sm:$0x3]  ;;  %v987_v53 = vrot.slane %v1902_v0, %v986_v15 }
 0x135   : >> { %v882_v17 = vmul.f32 %v1624_v57, %v881_v7  ;;  %v883_v18 = vmul.f32 %v1625_v60, %v881_v7  ;;  %v890_v19 = vmul.f32 %v1624_v57, %v889_v8  ;;  %v891_v20 = vmul.f32 %v1625_v60, %v889_v8  ;;  %v1630_v50 = vld [vmem:[%s2159_s24 + $0x48] sm:$0xff]  ;;  %v1631_v51 = vld [vmem:[%s2159_s24 + $0x50] sm:$0xff] }
 0x136   : >> { %v892_v21 = vmul.f32 %v1626_v63, %v889_v8  ;;  %v910_v22 = vmul.f32 %v1624_v57, %v909_v9  ;;  %v911_v23 = vmul.f32 %v1625_v60, %v909_v9  ;;  %v912_v24 = vmul.f32 %v1626_v63, %v909_v9  ;;  %v1632_v60 = vld [vmem:[%s2159_s24 + $0x58] sm:$0x3] }
 0x137   : >> { %v897_v26 = vrot.slane %v890_v19, 1  ;;  %v898_v27 = vrot.slane %v891_v20, 1  ;;  %v936_v28 = vmul.f32 %v1627_v11, %v935_v10  ;;  %v937_v29 = vmul.f32 %v1628_v12, %v935_v10 }
 0x138   : >> { %v900_v30 = vrot.slane %v892_v21, 1  ;;  %v917_v31 = vrot.slane %v910_v22, 2  ;;  %v918_v32 = vrot.slane %v911_v23, 2  ;;  %v920_v33 = vrot.slane %v912_v24, 2 }
 0x139   : >> { %v899_v34 = vsel %vm896_vm5, %v897_v26, %v898_v27  ;;  %v944_v35 = vmul.f32 %v1627_v11, %v943_v13  ;;  %v945_v36 = vmul.f32 %v1628_v12, %v943_v13  ;;  %v946_v37 = vmul.f32 %v1629_v25, %v943_v13 }
 0x13a   : >> { %v901_v38 = vsel %vm896_vm5, %v898_v27, %v900_v30  ;;  %v904_v39 = vadd.f32 %v899_v34, %v882_v17  ;;  %v919_v40 = vsel %vm916_vm6, %v917_v31, %v918_v32  ;;  %v921_v41 = vsel %vm916_vm6, %v918_v32, %v920_v33 }
 0x13b   : >> { %v905_v42 = vadd.f32 %v901_v38, %v883_v18  ;;  %v950_v43 = vrot.slane %v944_v35, 1  ;;  %v951_v44 = vrot.slane %v945_v36, 1  ;;  %v953_v45 = vrot.slane %v946_v37, 1 }
 0x13c   : >> { %v924_v46 = vadd.f32 %v919_v40, %v904_v39  ;;  %v963_v47 = vmul.f32 %v1627_v11, %v962_v14  ;;  %v964_v48 = vmul.f32 %v1628_v12, %v962_v14  ;;  %v965_v49 = vmul.f32 %v1629_v25, %v962_v14 }
 0x13d   : >> { %v925_v52 = vadd.f32 %v921_v41, %v905_v42  ;;  %v952_v58 = vsel %vm896_vm5, %v950_v43, %v951_v44  ;;  %v954_v59 = vsel %vm896_vm5, %v951_v44, %v953_v45  ;;  %v988_v62 = vmul.f32 %v1630_v50, %v987_v53 }
 0x13e   : >> { %v938_v54 = vadd.f32 %v936_v28, %v924_v46  ;;  %v969_v55 = vrot.slane %v963_v47, 2  ;;  %v970_v56 = vrot.slane %v964_v48, 2  ;;  %v972_v57 = vrot.slane %v965_v49, 2 }
 0x13f   : >> { %v939_v61 = vadd.f32 %v937_v29, %v925_v52  ;;  %v989_v63 = vmul.f32 %v1631_v51, %v987_v53  ;;  %v995_v7 = vrot.slane %v1902_v0, %v994_v16  ;;  %v1015_v11 = vmul.f32 %v1907_v1, %v1630_v50 }
 0x140   : >> { %v957_v8 = vadd.f32 %v952_v58, %v938_v54  ;;  %v971_v9 = vsel %vm916_vm6, %v969_v55, %v970_v56  ;;  %v973_v10 = vsel %vm916_vm6, %v970_v56, %v972_v57  ;;  %v1016_v18 = vmul.f32 %v1907_v1, %v1631_v51  ;;  %v1360_v56 = vld [vmem:[%s1986_s15 + $0x10] sm:$0xff] (%p868_p5) }
 0x141   : >> { %v958_v12 = vadd.f32 %v954_v59, %v939_v61  ;;  %v996_v13 = vmul.f32 %v1630_v50, %v995_v7  ;;  %v997_v14 = vmul.f32 %v1631_v51, %v995_v7  ;;  %v998_v15 = vmul.f32 %v1632_v60, %v995_v7 }
 0x142   : >> { %v976_v17 = vadd.f32 %v971_v9, %v957_v8  ;;  %v1017_v19 = vmul.f32 %v1907_v1, %v1632_v60  ;;  %v1021_v20 = vrot.slane %v1015_v11, 2  ;;  %v1022_v25 = vrot.slane %v1016_v18, 2  ;;  %v1361_v9 = vld [vmem:[%s1986_s15 + $0x18] sm:$0xff] (%p868_p5) }
 0x143   : >> { %v977_v21 = vadd.f32 %v973_v10, %v958_v12  ;;  %v1002_v16 = vrot.slane %v996_v13, 1  ;;  %v1003_v22 = vrot.slane %v997_v14, 1  ;;  %v1005_v23 = vrot.slane %v998_v15, 1  ;;  %v1359_v13 = vld [vmem:[%s1986_s15 + $0x8] sm:$0xff] (%p868_p5) }
 0x144   : >> { %v990_v24 = vadd.f32 %v988_v62, %v976_v17  ;;  %v1024_v26 = vrot.slane %v1017_v19, 2  ;;  %v1023_v31 = vsel %vm916_vm6, %v1021_v20, %v1022_v25  ;;  %v1637_v43 = vcombine.low (%p868_p5), %v1917_v3, %v1922_v4  ;;  %v1358_v62 = vld [vmem:[%s1986_s15] sm:$0xff] (%p868_p5) }
 0x145   : >> { %v991_v27 = vadd.f32 %v989_v63, %v977_v21  ;;  %v1004_v28 = vsel %vm896_vm5, %v1002_v16, %v1003_v22  ;;  %v1006_v29 = vsel %vm896_vm5, %v1003_v22, %v1005_v23  ;;  %v1364_v16 = vld [vmem:[%s1986_s15 + $0x30] sm:$0xff] (%p868_p5) }
 0x146   : >> { %v1009_v30 = vadd.f32 %v1004_v28, %v990_v24  ;;  %v1025_v32 = vsel %vm916_vm6, %v1022_v25, %v1024_v26  ;;  %1728 = vmatprep.subr.bf16.mxu1 (%p868_p5), %v1637_v43  ;;  %v1362_v25 = vld [vmem:[%s1986_s15 + $0x20] sm:$0xff] (%p868_p5) }
 0x147   : >> { %v1010_v33 = vadd.f32 %v1006_v29, %v991_v27  ;;  %1729 = vmatpush3.bf16.msra.mxu1 (%p868_p5), %v1637_v43  ;;  %v1365_v29 = vld [vmem:[%s1986_s15 + $0x38] sm:$0xff] (%p868_p5) }
 0x148   : >> { %v1028_v34 = vadd.f32 %v1023_v31, %v1009_v30 }
 0x149   : >> { %v1029_v35 = vadd.f32 %v1025_v32, %v1010_v33  ;;  %v1363_v33 = vld [vmem:[%s1986_s15 + $0x28] sm:$0xff] (%p868_p5) }
 0x14a   : >> { %v1036_v36 = vadd.f32 %v1912_v2, %v1028_v34 }
 0x14b   : >> { %v1037_v37 = vadd.f32 %v1912_v2, %v1029_v35 }
 0x14c   : >> { %v1038_v38 = vmax.f32 %v1036_v36, 0.0 }
 0x14d   : >> { %v1039_v39 = vmax.f32 %v1037_v37, 0.0  ;;  %870 = sbr.rel (!%p868_p5) target bundleno = 301 (0x12d), region = 102 }
 0x14e   : >> { %v1040_v40 = vmin.f32 %v1038_v38, 6.0 }
 0x14f   : >> { %v1041_v41 = vmin.f32 %v1039_v39, 6.0 }
 0x151   : >> { %v1042_v42 = vpack.c.bf16 %v1041_v41, %v1040_v40  ;;  %v1368_v41 = vld [vmem:[%s1986_s15 + $0x50] sm:$0xff] (%p868_p5) }
 0x153   : >> { %1048 = vst.msk [vmem:[%s1047_s28] sm:$0xff] %vm371_vm3, %v1042_v42 }
 0x15a   : > { %v1049_v44 = vld [vmem:[#allocation3] sm:$0xff]  ;;  %v1050_v45 = vld [vmem:[#allocation3 + $0x8] sm:$0xff]  ;;  %v1051_v46 = vld [vmem:[#allocation3 + $0x10] sm:$0xff] }
 0x15b   : > { %1730 = vmatprep.mubr.msk.bf16.mxu1 %vm371_vm3, %v1049_v44  ;;  %v1052_v47 = vld [vmem:[#allocation3 + $0x18] sm:$0xff]  ;;  %v1053_v48 = vld [vmem:[#allocation3 + $0x20] sm:$0xff]  ;;  %v1054_v0 = vld [vmem:[#allocation3 + $0x28] sm:$0xff] }
 0x15c   : > { %1731 = vmatmul.mubr.msk.bf16.vlgmr.msra.gmra.mrb[0].mxu1 %vm371_vm3, %v1050_v45  ;;  %v1055_v1 = vld [vmem:[#allocation3 + $0x30] sm:$0xff]  ;;  %v1056_v2 = vld [vmem:[#allocation3 + $0x38] sm:$0xff]  ;;  %v1057_v3 = vld [vmem:[#allocation3 + $0x40] sm:$0xff] }
 0x15d   : > { %1734 = vmatprep.mubr.msk.bf16.mxu1 %vm371_vm3, %v1051_v46  ;;  %v1058_v4 = vld [vmem:[#allocation3 + $0x48] sm:$0xff]  ;;  %v1059_v49 = vld [vmem:[#allocation3 + $0x50] sm:$0xff]  ;;  %v1060_v50 = vld [vmem:[#allocation3 + $0x58] sm:$0xff] }
 0x15e   : > { %v1061_v51 = vld [vmem:[#allocation3 + $0x60] sm:$0xff]  ;;  %v1062_v52 = vld [vmem:[#allocation3 + $0x68] sm:$0xff]  ;;  %v1063_v58 = vld [vmem:[#allocation3 + $0x70] sm:$0xff] }
 0x15f   : > { %v1064_v59 = vld [vmem:[#allocation3 + $0x78] sm:$0xff]  ;;  %v1366_v45 = vld [vmem:[%s1986_s15 + $0x40] sm:$0xff] }
 0x164   : > { %1735 = vmatmul.mubr.msk.bf16.gmra.mrb[4].mxu1 %vm371_vm3, %v1052_v47 }
 0x165   : > { %1738 = vmatprep.mubr.msk.bf16.mxu1 %vm371_vm3, %v1053_v48 }
 0x16c   : > { %1739 = vmatmul.mubr.msk.bf16.gmra.mrb[8].mxu1 %vm371_vm3, %v1054_v0  ;;  %v1369_v0 = vld [vmem:[%s1986_s15 + $0x58] sm:$0xff] }
 0x16d   : > { %1742 = vmatprep.mubr.msk.bf16.mxu1 %vm371_vm3, %v1055_v1 }
 0x174   : > { %1743 = vmatmul.mubr.msk.bf16.gmra.mrb[12].mxu1 %vm371_vm3, %v1056_v2 }
 0x175   : > { %1746 = vmatprep.mubr.msk.bf16.mxu1 %vm371_vm3, %v1057_v3 }
 0x17c   : > { %1747 = vmatmul.mubr.msk.bf16.gmra.mrb[16].mxu1 %vm371_vm3, %v1058_v4  ;;  %v1367_v4 = vld [vmem:[%s1986_s15 + $0x48] sm:$0xff] }
 0x17d   : > { %1750 = vmatprep.mubr.msk.bf16.mxu1 %vm371_vm3, %v1059_v49 }
 0x184   : > { %1751 = vmatmul.mubr.msk.bf16.gmra.mrb[20].mxu1 %vm371_vm3, %v1060_v50 }
 0x185   : > { %1754 = vmatprep.mubr.msk.bf16.mxu1 %vm371_vm3, %v1061_v51 }
 0x18c   : > { %1755 = vmatmul.mubr.msk.bf16.gmra.mrb[24].mxu1 %vm371_vm3, %v1062_v52 }
 0x18d   : > { %1758 = vmatprep.mubr.msk.bf16.mxu1 %vm371_vm3, %v1063_v58 }
 0x194   : > { %1759 = vmatmul.mubr.msk.bf16.gmra.mrb[28].mxu1 %vm371_vm3, %v1064_v59 }
 0x22f   : > { %v1732_v53 = vpop.f32.mrb[0].mxu1 }
 0x230   : > { %v1288_v54 = vmul.f32 %v1732_v53, %v1927_v5  ;;  %v1153_v55 = vpop.f32.mrb[1].mxu1 }
 0x231   : > { %v1286_v57 = vmul.f32 %v1927_v5, %v1153_v55  ;;  %v1733_v60 = vpop.f32.mrb[2].mxu1 }
 0x232   : > { %v1326_v61 = vadd.f32 %v1932_v6, %v1288_v54  ;;  %v1289_v63 = vmul.f32 %v1733_v60, %v1927_v5  ;;  %v1156_v7 = vpop.f32.mrb[3].mxu1  ;;  %v1372_v54 = vld [vmem:[%s1986_s15 + $0x70] sm:$0xff]  ;;  %v1370_v60 = vld [vmem:[%s1986_s15 + $0x60] sm:$0xff] }
 0x233   : > { %v1324_v8 = vadd.f32 %v1932_v6, %v1286_v57  ;;  %v1287_v10 = vmul.f32 %v1927_v5, %v1156_v7  ;;  %v1373_v7 = vld [vmem:[%s1986_s15 + $0x78] sm:$0xff] }
 0x234   : > { %v1392_v11 = vadd.f32 %v1360_v56, %v1326_v61  ;;  %v1327_v12 = vadd.f32 %v1932_v6, %v1289_v63 }
 0x235   : > { %v1390_v14 = vadd.f32 %v1358_v62, %v1324_v8  ;;  %v1325_v15 = vadd.f32 %v1932_v6, %v1287_v10 }
 0x236   : > { %1424 = vst.msk [vmem:[%s1991_s18 + $0x10] sm:$0xff] %vm478_vm4, %v1392_v11  ;;  %v1393_v17 = vadd.f32 %v1361_v9, %v1327_v12  ;;  %v1371_v11 = vld [vmem:[%s1986_s15 + $0x68] sm:$0xff] }
 0x237   : > { %1422 = vst.msk [vmem:[%s1991_s18] sm:$0xff] %vm478_vm4, %v1390_v14  ;;  %v1391_v18 = vadd.f32 %v1359_v13, %v1325_v15  ;;  %v1736_v19 = vpop.f32.mrb[4].mxu1 }
 0x238   : > { %1425 = vst.msk [vmem:[%s1991_s18 + $0x18] sm:$0xff] %vm478_vm4, %v1393_v17  ;;  %v1292_v20 = vmul.f32 %v1736_v19, %v1927_v5  ;;  %v1169_v21 = vpop.f32.mrb[5].mxu1 }
 0x239   : > { %1423 = vst.msk [vmem:[%s1991_s18 + $0x8] sm:$0xff] %vm478_vm4, %v1391_v18  ;;  %v1290_v22 = vmul.f32 %v1927_v5, %v1169_v21  ;;  %v1737_v23 = vpop.f32.mrb[6].mxu1 }
 0x23a   : > { %v1330_v24 = vadd.f32 %v1932_v6, %v1292_v20  ;;  %v1293_v26 = vmul.f32 %v1737_v23, %v1927_v5  ;;  %v1172_v27 = vpop.f32.mrb[7].mxu1  ;;  %v1376_v20 = vld [vmem:[%s1986_s15 + $0x90] sm:$0xff]  ;;  %v1374_v23 = vld [vmem:[%s1986_s15 + $0x80] sm:$0xff] }
 0x23b   : > { %v1328_v28 = vadd.f32 %v1932_v6, %v1290_v22  ;;  %v1291_v30 = vmul.f32 %v1927_v5, %v1172_v27  ;;  %v1377_v27 = vld [vmem:[%s1986_s15 + $0x98] sm:$0xff] }
 0x23c   : > { %v1396_v31 = vadd.f32 %v1364_v16, %v1330_v24  ;;  %v1331_v32 = vadd.f32 %v1932_v6, %v1293_v26 }
 0x23d   : > { %v1394_v34 = vadd.f32 %v1362_v25, %v1328_v28  ;;  %v1329_v35 = vadd.f32 %v1932_v6, %v1291_v30 }
 0x23e   : > { %1428 = vst.msk [vmem:[%s1991_s18 + $0x30] sm:$0xff] %vm478_vm4, %v1396_v31  ;;  %v1397_v36 = vadd.f32 %v1365_v29, %v1331_v32  ;;  %v1375_v31 = vld [vmem:[%s1986_s15 + $0x88] sm:$0xff] }
 0x23f   : > { %1426 = vst.msk [vmem:[%s1991_s18 + $0x20] sm:$0xff] %vm478_vm4, %v1394_v34  ;;  %v1395_v37 = vadd.f32 %v1363_v33, %v1329_v35  ;;  %v1740_v38 = vpop.f32.mrb[8].mxu1 }
 0x240   : > { %1429 = vst.msk [vmem:[%s1991_s18 + $0x38] sm:$0xff] %vm478_vm4, %v1397_v36  ;;  %v1296_v39 = vmul.f32 %v1740_v38, %v1927_v5  ;;  %v1185_v40 = vpop.f32.mrb[9].mxu1 }
 0x241   : > { %1427 = vst.msk [vmem:[%s1991_s18 + $0x28] sm:$0xff] %vm478_vm4, %v1395_v37  ;;  %v1294_v42 = vmul.f32 %v1927_v5, %v1185_v40  ;;  %v1741_v43 = vpop.f32.mrb[10].mxu1 }
 0x242   : > { %v1334_v44 = vadd.f32 %v1932_v6, %v1296_v39  ;;  %v1297_v46 = vmul.f32 %v1741_v43, %v1927_v5  ;;  %v1188_v47 = vpop.f32.mrb[11].mxu1  ;;  %v1380_v39 = vld [vmem:[%s1986_s15 + $0xb0] sm:$0xff]  ;;  %v1378_v43 = vld [vmem:[%s1986_s15 + $0xa0] sm:$0xff] }
 0x243   : > { %v1332_v48 = vadd.f32 %v1932_v6, %v1294_v42  ;;  %v1295_v1 = vmul.f32 %v1927_v5, %v1188_v47  ;;  %v1381_v47 = vld [vmem:[%s1986_s15 + $0xb8] sm:$0xff] }
 0x244   : > { %v1400_v2 = vadd.f32 %v1368_v41, %v1334_v44  ;;  %v1335_v3 = vadd.f32 %v1932_v6, %v1297_v46 }
 0x245   : > { %v1398_v49 = vadd.f32 %v1366_v45, %v1332_v48  ;;  %v1333_v50 = vadd.f32 %v1932_v6, %v1295_v1 }
 0x246   : > { %1432 = vst.msk [vmem:[%s1991_s18 + $0x50] sm:$0xff] %vm478_vm4, %v1400_v2  ;;  %v1401_v51 = vadd.f32 %v1369_v0, %v1335_v3  ;;  %v1379_v2 = vld [vmem:[%s1986_s15 + $0xa8] sm:$0xff] }
 0x247   : > { %1430 = vst.msk [vmem:[%s1991_s18 + $0x40] sm:$0xff] %vm478_vm4, %v1398_v49  ;;  %v1399_v52 = vadd.f32 %v1367_v4, %v1333_v50  ;;  %v1744_v58 = vpop.f32.mrb[12].mxu1 }
 0x248   : > { %1433 = vst.msk [vmem:[%s1991_s18 + $0x58] sm:$0xff] %vm478_vm4, %v1401_v51  ;;  %v1300_v59 = vmul.f32 %v1744_v58, %v1927_v5  ;;  %v1201_v53 = vpop.f32.mrb[13].mxu1 }
 0x249   : > { %1431 = vst.msk [vmem:[%s1991_s18 + $0x48] sm:$0xff] %vm478_vm4, %v1399_v52  ;;  %v1298_v55 = vmul.f32 %v1927_v5, %v1201_v53  ;;  %v1745_v56 = vpop.f32.mrb[14].mxu1 }
 0x24a   : > { %v1338_v57 = vadd.f32 %v1932_v6, %v1300_v59  ;;  %v1301_v61 = vmul.f32 %v1745_v56, %v1927_v5  ;;  %v1204_v62 = vpop.f32.mrb[15].mxu1  ;;  %v1384_v59 = vld [vmem:[%s1986_s15 + $0xd0] sm:$0xff]  ;;  %v1382_v56 = vld [vmem:[%s1986_s15 + $0xc0] sm:$0xff] }
 0x24b   : > { %v1336_v63 = vadd.f32 %v1932_v6, %v1298_v55  ;;  %v1299_v8 = vmul.f32 %v1927_v5, %v1204_v62  ;;  %v1385_v62 = vld [vmem:[%s1986_s15 + $0xd8] sm:$0xff] }
 0x24c   : > { %v1404_v9 = vadd.f32 %v1372_v54, %v1338_v57  ;;  %v1339_v10 = vadd.f32 %v1932_v6, %v1301_v61 }
 0x24d   : > { %v1402_v12 = vadd.f32 %v1370_v60, %v1336_v63  ;;  %v1337_v13 = vadd.f32 %v1932_v6, %v1299_v8 }
 0x24e   : > { %1436 = vst.msk [vmem:[%s1991_s18 + $0x70] sm:$0xff] %vm478_vm4, %v1404_v9  ;;  %v1405_v14 = vadd.f32 %v1373_v7, %v1339_v10  ;;  %v1383_v9 = vld [vmem:[%s1986_s15 + $0xc8] sm:$0xff] }
 0x24f   : > { %1434 = vst.msk [vmem:[%s1991_s18 + $0x60] sm:$0xff] %vm478_vm4, %v1402_v12  ;;  %v1403_v15 = vadd.f32 %v1371_v11, %v1337_v13  ;;  %v1748_v17 = vpop.f32.mrb[16].mxu1 }
 0x250   : > { %1437 = vst.msk [vmem:[%s1991_s18 + $0x78] sm:$0xff] %vm478_vm4, %v1405_v14  ;;  %v1304_v18 = vmul.f32 %v1748_v17, %v1927_v5  ;;  %v1217_v19 = vpop.f32.mrb[17].mxu1 }
 0x251   : > { %1435 = vst.msk [vmem:[%s1991_s18 + $0x68] sm:$0xff] %vm478_vm4, %v1403_v15  ;;  %v1302_v21 = vmul.f32 %v1927_v5, %v1217_v19  ;;  %v1749_v16 = vpop.f32.mrb[18].mxu1 }
 0x252   : > { %v1342_v22 = vadd.f32 %v1932_v6, %v1304_v18  ;;  %v1305_v24 = vmul.f32 %v1749_v16, %v1927_v5  ;;  %v1220_v25 = vpop.f32.mrb[19].mxu1  ;;  %v1388_v18 = vld [vmem:[%s1986_s15 + $0xf0] sm:$0xff]  ;;  %v1386_v16 = vld [vmem:[%s1986_s15 + $0xe0] sm:$0xff] }
 0x253   : > { %v1340_v26 = vadd.f32 %v1932_v6, %v1302_v21  ;;  %v1303_v28 = vmul.f32 %v1927_v5, %v1220_v25  ;;  %v1389_v25 = vld [vmem:[%s1986_s15 + $0xf8] sm:$0xff] }
 0x254   : > { %v1408_v29 = vadd.f32 %v1376_v20, %v1342_v22  ;;  %v1343_v30 = vadd.f32 %v1932_v6, %v1305_v24 }
 0x255   : > { %v1406_v32 = vadd.f32 %v1374_v23, %v1340_v26  ;;  %v1341_v33 = vadd.f32 %v1932_v6, %v1303_v28 }
 0x256   : > { %1440 = vst.msk [vmem:[%s1991_s18 + $0x90] sm:$0xff] %vm478_vm4, %v1408_v29  ;;  %v1409_v34 = vadd.f32 %v1377_v27, %v1343_v30  ;;  %v1387_v29 = vld [vmem:[%s1986_s15 + $0xe8] sm:$0xff] }
 0x257   : > { %1438 = vst.msk [vmem:[%s1991_s18 + $0x80] sm:$0xff] %vm478_vm4, %v1406_v32  ;;  %v1407_v35 = vadd.f32 %v1375_v31, %v1341_v33  ;;  %v1752_v36 = vpop.f32.mrb[20].mxu1 }
 0x258   : > { %1441 = vst.msk [vmem:[%s1991_s18 + $0x98] sm:$0xff] %vm478_vm4, %v1409_v34  ;;  %v1308_v37 = vmul.f32 %v1752_v36, %v1927_v5  ;;  %v1233_v38 = vpop.f32.mrb[21].mxu1 }
 0x259   : > { %1439 = vst.msk [vmem:[%s1991_s18 + $0x88] sm:$0xff] %vm478_vm4, %v1407_v35  ;;  %v1306_v40 = vmul.f32 %v1927_v5, %v1233_v38  ;;  %v1753_v41 = vpop.f32.mrb[22].mxu1 }
 0x25a   : > { %v1346_v42 = vadd.f32 %v1932_v6, %v1308_v37  ;;  %v1309_v44 = vmul.f32 %v1753_v41, %v1927_v5  ;;  %v1236_v45 = vpop.f32.mrb[23].mxu1 }
 0x25b   : > { %v1344_v46 = vadd.f32 %v1932_v6, %v1306_v40  ;;  %v1307_v48 = vmul.f32 %v1927_v5, %v1236_v45 }
 0x25c   : > { %v1412_v0 = vadd.f32 %v1380_v39, %v1346_v42  ;;  %v1347_v1 = vadd.f32 %v1932_v6, %v1309_v44 }
 0x25d   : > { %v1410_v3 = vadd.f32 %v1378_v43, %v1344_v46  ;;  %v1345_v4 = vadd.f32 %v1932_v6, %v1307_v48 }
 0x25e   : > { %1444 = vst.msk [vmem:[%s1991_s18 + $0xb0] sm:$0xff] %vm478_vm4, %v1412_v0  ;;  %v1413_v49 = vadd.f32 %v1381_v47, %v1347_v1 }
 0x25f   : > { %1442 = vst.msk [vmem:[%s1991_s18 + $0xa0] sm:$0xff] %vm478_vm4, %v1410_v3  ;;  %v1411_v50 = vadd.f32 %v1379_v2, %v1345_v4  ;;  %v1756_v51 = vpop.f32.mrb[24].mxu1 }
 0x260   : > { %1445 = vst.msk [vmem:[%s1991_s18 + $0xb8] sm:$0xff] %vm478_vm4, %v1413_v49  ;;  %v1312_v52 = vmul.f32 %v1756_v51, %v1927_v5  ;;  %v1249_v58 = vpop.f32.mrb[25].mxu1 }
 0x261   : > { %1443 = vst.msk [vmem:[%s1991_s18 + $0xa8] sm:$0xff] %vm478_vm4, %v1411_v50  ;;  %v1310_v53 = vmul.f32 %v1927_v5, %v1249_v58  ;;  %v1757_v54 = vpop.f32.mrb[26].mxu1 }
 0x262   : > { %v1350_v55 = vadd.f32 %v1932_v6, %v1312_v52  ;;  %v1313_v57 = vmul.f32 %v1757_v54, %v1927_v5  ;;  %v1252_v60 = vpop.f32.mrb[27].mxu1 }
 0x263   : > { %v1348_v61 = vadd.f32 %v1932_v6, %v1310_v53  ;;  %v1311_v63 = vmul.f32 %v1927_v5, %v1252_v60 }
 0x264   : > { %v1416_v7 = vadd.f32 %v1384_v59, %v1350_v55  ;;  %v1351_v8 = vadd.f32 %v1932_v6, %v1313_v57 }
 0x265   : > { %v1414_v10 = vadd.f32 %v1382_v56, %v1348_v61  ;;  %v1349_v11 = vadd.f32 %v1932_v6, %v1311_v63 }
 0x266   : > { %1448 = vst.msk [vmem:[%s1991_s18 + $0xd0] sm:$0xff] %vm478_vm4, %v1416_v7  ;;  %v1417_v12 = vadd.f32 %v1385_v62, %v1351_v8 }
 0x267   : > { %1446 = vst.msk [vmem:[%s1991_s18 + $0xc0] sm:$0xff] %vm478_vm4, %v1414_v10  ;;  %v1415_v13 = vadd.f32 %v1383_v9, %v1349_v11  ;;  %v1760_v14 = vpop.f32.mrb[28].mxu1 }
 0x268   : > { %1449 = vst.msk [vmem:[%s1991_s18 + $0xd8] sm:$0xff] %vm478_vm4, %v1417_v12  ;;  %v1316_v15 = vmul.f32 %v1760_v14, %v1927_v5  ;;  %v1265_v17 = vpop.f32.mrb[29].mxu1 }
 0x269   : > { %1447 = vst.msk [vmem:[%s1991_s18 + $0xc8] sm:$0xff] %vm478_vm4, %v1415_v13  ;;  %v1314_v19 = vmul.f32 %v1927_v5, %v1265_v17  ;;  %v1761_v20 = vpop.f32.mrb[30].mxu1 }
 0x26a   : > { %v1354_v21 = vadd.f32 %v1932_v6, %v1316_v15  ;;  %v1317_v22 = vmul.f32 %v1761_v20, %v1927_v5  ;;  %v1268_v23 = vpop.f32.mrb[31].mxu1 }
 0x26b   : > { %v1352_v24 = vadd.f32 %v1932_v6, %v1314_v19  ;;  %v1315_v26 = vmul.f32 %v1927_v5, %v1268_v23 }
 0x26c   : > { %v1420_v27 = vadd.f32 %v1388_v18, %v1354_v21  ;;  %v1355_v28 = vadd.f32 %v1932_v6, %v1317_v22 }
 0x26d   : > { %v1418_v30 = vadd.f32 %v1386_v16, %v1352_v24  ;;  %v1353_v31 = vadd.f32 %v1932_v6, %v1315_v26 }
 0x26e   : > { %1452 = vst.msk [vmem:[%s1991_s18 + $0xf0] sm:$0xff] %vm478_vm4, %v1420_v27  ;;  %v1421_v32 = vadd.f32 %v1389_v25, %v1355_v28 }
 0x26f   : > { %1450 = vst.msk [vmem:[%s1991_s18 + $0xe0] sm:$0xff] %vm478_vm4, %v1418_v30  ;;  %v1419_v33 = vadd.f32 %v1387_v29, %v1353_v31 }
 0x270   : > { %1453 = vst.msk [vmem:[%s1991_s18 + $0xf8] sm:$0xff] %vm478_vm4, %v1421_v32 }
 0x271   : > { %1451 = vst.msk [vmem:[%s1991_s18 + $0xe8] sm:$0xff] %vm478_vm4, %v1419_v33 }
 0x272 PF: > { %s19_s11 = sadd.s32 1, %s1822_s11   ;;  %s2401_s30 = smov %s1818_s10 }
 0x273   : > { %p16_p6 = scmp.ge.s32.totalorder %s19_s11, 4   ;;  %s2402_s10 = smov %s2404_s12 }
 0x275   :  { %18 = sbr.rel (!%p16_p6) target bundleno = 2 (0x2), region = 113 }

</bundles_post_ra>
